<compile_context>
chip_gen: v6e
topology: v6e:2x2x1
jax: 0.10.0
libtpu: 0.0.40
codegen_flags: <defaults>
</compile_context>

<pallas_src>
import math
import functools

import jax
import jax.numpy as jnp
from jax.experimental import pallas as pl
from jax.experimental.pallas import tpu as pltpu

NEG_INF = jnp.float32(-1e9)
_VMEM_LIMIT_BYTES = 48 * 1024 * 1024   # > 16/32 MiB scoped defaults, < v7x physical


# ----------------------------------------------------------------------------
# In-kernel helpers
# ----------------------------------------------------------------------------

def _layernorm(x, g, b, eps):
    # f32 statistics (v5e VPU/EUP have no bf16 path)
    mu = jnp.mean(x, axis=-1, keepdims=True)
    var = jnp.mean(jnp.square(x - mu), axis=-1, keepdims=True)
    return (x - mu) * jax.lax.rsqrt(var + eps) * g + b


def _mh_attention(q, k, v, addmask, num_heads, out_sc):
    """Multi-head attention core on (T,D) query / (S,D) key-value tiles.

    Heads are static lane slices of width dh.  The 1/sqrt(dh) scale is already
    folded into the Q projection by the wrapper.  Per-head outputs are written
    into the bf16 VMEM scratch `out_sc` at static lane offsets so the caller
    can run ONE full-width (T,D)@(D,D) output projection afterwards.
    """
    D = q.shape[-1]
    dh = D // num_heads
    qb = q.astype(jnp.bfloat16)
    kb = k.astype(jnp.bfloat16)
    vb = v.astype(jnp.bfloat16)
    for h in range(num_heads):
        sl = slice(h * dh, (h + 1) * dh)
        # scores = q_h @ k_h^T  (contraction on dh) -> (T, S), f32 accumulation
        s = jax.lax.dot_general(qb[:, sl], kb[:, sl], (((1,), (1,)), ((), ())),
                                preferred_element_type=jnp.float32) + addmask
        s = s - jnp.max(s, axis=-1, keepdims=True)
        p = jnp.exp(s)
        p = p * pl.reciprocal(jnp.sum(p, axis=-1, keepdims=True), approx=True)
        oh = jnp.dot(p.astype(jnp.bfloat16), vb[:, sl],
                     preferred_element_type=jnp.float32)          # (T, dh)
        out_sc[:, sl] = oh.astype(jnp.bfloat16)
    return out_sc[...]                                            # (T, D) bf16


# ----------------------------------------------------------------------------
# Fused Pallas kernels
# ----------------------------------------------------------------------------

def _attn_block_kernel(x_ref, enc_ref,
                       g1_ref, b1_ref, wqkv_ref, bqkv_ref, wo1_ref, bo1_ref,
                       g2_ref, b2_ref, wq2_ref, bq2_ref, wkv2_ref, bkv2_ref,
                       wo2_ref, bo2_ref,
                       cm_s_ref, kp_s_ref, cm_x_ref, kp_x_ref,
                       o_ref, attn_sc, *, num_heads, eps):
    """Pre-norm self-attention + pre-norm cross-attention, fused per layer:
         x = x + SelfMHA(LN1(x));  x = x + CrossMHA(LN2(x), enc);  out = bf16(x)
    """
    D = x_ref.shape[-1]
    x = x_ref[...].astype(jnp.float32)                            # (T, D) f32

    # ---------------- self-attention sublayer ----------------
    y = _layernorm(x, g1_ref[...], b1_ref[...], eps)
    qkv = jnp.dot(y.astype(jnp.bfloat16), wqkv_ref[...],
                  preferred_element_type=jnp.float32) + bqkv_ref[...]  # (T, 3D)
    mask_s = cm_s_ref[...] + kp_s_ref[...]                        # (T,T) + (1,T)
    attn = _mh_attention(qkv[:, :D], qkv[:, D:2 * D], qkv[:, 2 * D:],
                         mask_s, num_heads, attn_sc)
    x = x + jnp.dot(attn, wo1_ref[...],
                    preferred_element_type=jnp.float32) + bo1_ref[...]

    # ---------------- cross-attention sublayer ----------------
    y = _layernorm(x, g2_ref[...], b2_ref[...], eps)
    q2 = jnp.dot(y.astype(jnp.bfloat16), wq2_ref[...],
                 preferred_element_type=jnp.float32) + bq2_ref[...]    # (T, D)
    kv = jnp.dot(enc_ref[...], wkv2_ref[...],
                 preferred_element_type=jnp.float32) + bkv2_ref[...]   # (S, 2D)
    mask_x = cm_x_ref[...] + kp_x_ref[...]                        # (T,S) + (1,S)
    attn2 = _mh_attention(q2, kv[:, :D], kv[:, D:], mask_x, num_heads, attn_sc)
    x = x + jnp.dot(attn2, wo2_ref[...],
                    preferred_element_type=jnp.float32) + bo2_ref[...]

    o_ref[...] = x.astype(o_ref.dtype)


def _ffn_sublayer_kernel(x_ref, g_ref, b_ref, w1_ref, b1_ref, w2_ref, b2_ref,
                         o_ref, y_sc, acc_sc, *, eps):
    # pre-norm FFN, F axis tiled as a reduction with a VMEM accumulator:
    #   out = x + relu(LN3(x) @ W1 + b1) @ W2 + b2
    fk = pl.program_id(1)

    @pl.when(fk == 0)
    def _():
        y_sc[...] = _layernorm(x_ref[...].astype(jnp.float32),
                               g_ref[...], b_ref[...], eps).astype(jnp.bfloat16)
        acc_sc[...] = jnp.zeros_like(acc_sc)

    h = jnp.maximum(
        jnp.dot(y_sc[...], w1_ref[...], preferred_element_type=jnp.float32)
        + b1_ref[...], 0.0)
    acc_sc[...] += jnp.dot(h.astype(jnp.bfloat16), w2_ref[...],
                           preferred_element_type=jnp.float32)

    @pl.when(fk == pl.num_programs(1) - 1)
    def _():
        o_ref[...] = (x_ref[...].astype(jnp.float32) + acc_sc[...]
                      + b2_ref[...]).astype(o_ref.dtype)


def _head_kernel(x_ref, g_ref, b_ref, w_ref, hb_ref, o_ref, *, eps):
    # fused tail LayerNorm + head projection (vocab padded to lane-dense width)
    y = _layernorm(x_ref[...].astype(jnp.float32), g_ref[...], b_ref[...], eps)
    o_ref[...] = (jnp.dot(y.astype(jnp.bfloat16), w_ref[...],
                          preferred_element_type=jnp.float32)
                  + hb_ref[...]).astype(o_ref.dtype)


# ----------------------------------------------------------------------------
# pallas_call wrappers
# ----------------------------------------------------------------------------

def attn_block(x, enc, lp, cm_s, kp_s, cm_x, kp_x, num_heads, eps=1e-5):
    """Fused (self-attn + cross-attn) sublayers for one layer. x,enc: bf16."""
    B, T, D = x.shape
    S = enc.shape[1]
    sq = pl.Squeezed()
    const = lambda shape: pl.BlockSpec(shape, lambda b: (0, 0))
    sa, ca = lp["self"], lp["cross"]
    kern = functools.partial(_attn_block_kernel, num_heads=num_heads, eps=eps)
    return pl.pallas_call(
        kern,
        out_shape=jax.ShapeDtypeStruct((B, T, D), jnp.bfloat16),
        grid=(B,),
        in_specs=[
            pl.BlockSpec((sq, T, D), lambda b: (b, 0, 0)),     # x
            pl.BlockSpec((sq, S, D), lambda b: (b, 0, 0)),     # enc memory
            const((1, D)), const((1, D)),                      # ln1 g, b
            const((D, 3 * D)), const((1, 3 * D)),              # fused Wqkv, bqkv
            const((D, D)), const((1, D)),                      # Wo1, bo1
            const((1, D)), const((1, D)),                      # ln2 g, b
            const((D, D)), const((1, D)),                      # Wq2, bq2
            const((D, 2 * D)), const((1, 2 * D)),              # fused Wkv2, bkv2
            const((D, D)), const((1, D)),                      # Wo2, bo2
            const((T, T)),                                     # self causal mask
            pl.BlockSpec((sq, 1, T), lambda b: (b, 0, 0)),     # self kpad row
            const((T, S)),                                     # cross (memory) mask
            pl.BlockSpec((sq, 1, S), lambda b: (b, 0, 0)),     # cross kpad row
        ],
        out_specs=pl.BlockSpec((sq, T, D), lambda b: (b, 0, 0)),
        scratch_shapes=[pltpu.VMEM((T, D), jnp.bfloat16)],     # per-head concat buffer
        compiler_params=pltpu.CompilerParams(
            dimension_semantics=("parallel",),
            vmem_limit_bytes=_VMEM_LIMIT_BYTES),
    )(x, enc,
      sa["ln_g"], sa["ln_b"], sa["wqkv"], sa["bqkv"], sa["wo"], sa["bo"],
      ca["ln_g"], ca["ln_b"], ca["wq"], ca["bq"], ca["wkv"], ca["bkv"],
      ca["wo"], ca["bo"],
      cm_s, kp_s, cm_x, kp_x)


def _pick_f_tile(F):
    # largest 128-multiple divisor of F capped at 512 (keeps double-buffered
    # W1/W2 tiles small enough for v7x); only a non-128-multiple F falls back
    # to a single full-dim reduction block.
    for tf in (512, 256, 128):
        if F % tf == 0:
            return tf
    return F


def ffn_sublayer(x, p, eps=1e-5):
    B, T, D = x.shape
    M = B * T
    F = p["w1t"].shape[1]
    x2 = x.reshape(M, D)
    tm = M if M <= 512 else 512
    tf = _pick_f_tile(F)
    kern = functools.partial(_ffn_sublayer_kernel, eps=eps)
    out = pl.pallas_call(
        kern,
        out_shape=jax.ShapeDtypeStruct((M, D), jnp.bfloat16),
        grid=(pl.cdiv(M, tm), F // tf),
        in_specs=[
            pl.BlockSpec((tm, D), lambda i, k: (i, 0)),
            pl.BlockSpec((1, D), lambda i, k: (0, 0)),
            pl.BlockSpec((1, D), lambda i, k: (0, 0)),
            pl.BlockSpec((D, tf), lambda i, k: (0, k)),
            pl.BlockSpec((1, tf), lambda i, k: (0, k)),
            pl.BlockSpec((tf, D), lambda i, k: (k, 0)),
            pl.BlockSpec((1, D), lambda i, k: (0, 0)),
        ],
        out_specs=pl.BlockSpec((tm, D), lambda i, k: (i, 0)),
        scratch_shapes=[pltpu.VMEM((tm, D), jnp.bfloat16),   # LN output (MXU operand)
                        pltpu.VMEM((tm, D), jnp.float32)],   # f32 accumulator
        compiler_params=pltpu.CompilerParams(
            dimension_semantics=("parallel", "arbitrary"),
            vmem_limit_bytes=_VMEM_LIMIT_BYTES),
    )(x2, p["ln_g"], p["ln_b"], p["w1t"], p["b1"], p["w2t"], p["b2"])
    return out.reshape(B, T, D)


def tailnorm_head(x, tail_g, tail_b, head_wt, head_b, eps=1e-5):
    B, T, D = x.shape
    M = B * T
    Vp = head_wt.shape[1]                  # vocab padded to a multiple of 128
    x2 = x.reshape(M, D)
    tm = M if M <= 512 else 512
    tn = Vp if Vp <= 512 else 512
    kern = functools.partial(_head_kernel, eps=eps)
    out = pl.pallas_call(
        kern,
        out_shape=jax.ShapeDtypeStruct((M, Vp), jnp.float32),
        grid=(pl.cdiv(M, tm), pl.cdiv(Vp, tn)),
        in_specs=[
            pl.BlockSpec((tm, D), lambda i, j: (i, 0)),
            pl.BlockSpec((1, D), lambda i, j: (0, 0)),
            pl.BlockSpec((1, D), lambda i, j: (0, 0)),
            pl.BlockSpec((D, tn), lambda i, j: (0, j)),
            pl.BlockSpec((1, tn), lambda i, j: (0, j)),
        ],
        out_specs=pl.BlockSpec((tm, tn), lambda i, j: (i, j)),
        compiler_params=pltpu.CompilerParams(
            dimension_semantics=("parallel", "parallel"),
            vmem_limit_bytes=_VMEM_LIMIT_BYTES),
    )(x2, tail_g, tail_b, head_wt, head_b)
    return out.reshape(B, T, Vp)


# ----------------------------------------------------------------------------
# Model glue (plain JAX)
# ----------------------------------------------------------------------------

def sinusoidal_pe(T, D):
    pos = jnp.arange(T, dtype=jnp.float32)[:, None]
    div = jnp.exp(jnp.arange(0, D, 2, dtype=jnp.float32) * (-math.log(10000.0) / D))
    pe = jnp.zeros((T, D), jnp.float32)
    pe = pe.at[:, 0::2].set(jnp.sin(pos * div))
    pe = pe.at[:, 1::2].set(jnp.cos(pos * div))
    return pe


def prepare_params(params, num_heads):
    """One-time weight prep: transpose to (in,out), fuse QKV / KV, fold
    1/sqrt(dh) into the Q projection, cast weights to bf16, reshape biases /
    LN params to (1,N), and pad the head to a lane-dense vocab width."""
    V, D = params["emb"].shape
    dh = D // num_heads
    scale = 1.0 / math.sqrt(dh)
    bf = lambda w: w.astype(jnp.bfloat16)

    def prep_self(a, g, b):
        wqkv = jnp.concatenate([a["wq"].T * scale, a["wk"].T, a["wv"].T], axis=1)
        bqkv = jnp.concatenate([a["bq"] * scale, a["bk"], a["bv"]]).reshape(1, 3 * D)
        return {"ln_g": g.reshape(1, D), "ln_b": b.reshape(1, D),
                "wqkv": bf(wqkv), "bqkv": bqkv,
                "wo": bf(a["wo"].T), "bo": a["bo"].reshape(1, D)}

    def prep_cross(a, g, b):
        wkv = jnp.concatenate([a["wk"].T, a["wv"].T], axis=1)
        bkv = jnp.concatenate([a["bk"], a["bv"]]).reshape(1, 2 * D)
        return {"ln_g": g.reshape(1, D), "ln_b": b.reshape(1, D),
                "wq": bf(a["wq"].T * scale), "bq": (a["bq"] * scale).reshape(1, D),
                "wkv": bf(wkv), "bkv": bkv,
                "wo": bf(a["wo"].T), "bo": a["bo"].reshape(1, D)}

    layers = []
    for lp in params["layers"]:
        F = lp["w1"].shape[0]
        layers.append({
            "self": prep_self(lp["self_attn"], lp["ln1_g"], lp["ln1_b"]),
            "cross": prep_cross(lp["cross_attn"], lp["ln2_g"], lp["ln2_b"]),
            "ffn": {
                "ln_g": lp["ln3_g"].reshape(1, D), "ln_b": lp["ln3_b"].reshape(1, D),
                "w1t": bf(lp["w1"].T), "b1": lp["b1"].reshape(1, F),
                "w2t": bf(lp["w2"].T), "b2": lp["b2"].reshape(1, D),
            },
        })

    # pad vocab to a multiple of 128 so head stores are lane-dense (unmasked vst)
    Vp = ((V + 127) // 128) * 128
    head_wt = jnp.zeros((D, Vp), jnp.float32).at[:, :V].set(params["head_w"].T)
    head_b = jnp.zeros((1, Vp), jnp.float32).at[:, :V].set(params["head_b"])

    return {"emb": params["emb"], "layers": layers,
            "tail_g": params["tail_g"].reshape(1, D),
            "tail_b": params["tail_b"].reshape(1, D),
            "head_wt": bf(head_wt), "head_b": head_b,
            "vocab": V, "vocab_padded": Vp}


def transformer_decoder_forward(prep, tgt_ids, enc_feature,
                                tgt_causal_mask, enc_tgt_causal_mask,
                                tgt_key_padding_mask, enc_key_padding_mask,
                                num_heads):
    B, T = tgt_ids.shape
    V = prep["vocab"]
    D = prep["emb"].shape[1]
    S = enc_feature.shape[1]

    # embedding lookup (glue: gather) * sqrt(vocab_size) -- matches the module
    x = jnp.take(prep["emb"], tgt_ids, axis=0) * math.sqrt(V)
    # positional encoding (dropout_pe is identity in eval); bf16 activations
    x = (x + sinusoidal_pe(T, D)[None]).astype(jnp.bfloat16)
    enc_bf = enc_feature.astype(jnp.bfloat16)

    # tiny per-batch additive key-padding rows; the shared (T,S) causal/memory
    # mask is passed separately so no (B,T,S) mask is ever materialized.
    kpad_self = jnp.where(tgt_key_padding_mask, NEG_INF, 0.0).astype(
        jnp.float32).reshape(B, 1, T)
    kpad_cross = jnp.where(enc_key_padding_mask, NEG_INF, 0.0).astype(
        jnp.float32).reshape(B, 1, S)
    cmask_self = tgt_causal_mask.astype(jnp.float32)
    cmask_cross = enc_tgt_causal_mask.astype(jnp.float32)

    for lp in prep["layers"]:
        x = attn_block(x, enc_bf, lp, cmask_self, kpad_self,
                       cmask_cross, kpad_cross, num_heads)
        x = ffn_sublayer(x, lp["ffn"])

    # tail norm (add_tailnorm and norm_first -> LayerNorm) fused with the head;
    # drop the lane-padding of the vocab afterwards.
    logits = tailnorm_head(x, prep["tail_g"], prep["tail_b"],
                           prep["head_wt"], prep["head_b"])
    return logits[:, :, :V]


# ----------------------------------------------------------------------------
# Deterministic parameter construction (PyTorch layout, then prepared once)
# ----------------------------------------------------------------------------

def init_params(key, vocab, dim_model, num_heads, dim_ffn, num_layers, padding_val):
    keys = iter(jax.random.split(key, 8 + num_layers * 16))

    def nrm(shape, std):
        return std * jax.random.normal(next(keys), shape, jnp.float32)

    emb = nrm((vocab, dim_model), dim_model ** (-0.5))
    emb = emb.at[padding_val].set(0.0)

    def attn_params():
        std = dim_model ** (-0.5)
        return {
            "wq": nrm((dim_model, dim_model), std), "bq": jnp.zeros((dim_model,), jnp.float32),
            "wk": nrm((dim_model, dim_model), std), "bk": jnp.zeros((dim_model,), jnp.float32),
            "wv": nrm((dim_model, dim_model), std), "bv": jnp.zeros((dim_model,), jnp.float32),
            "wo": nrm((dim_model, dim_model), std), "bo": jnp.zeros((dim_model,), jnp.float32),
        }

    layers = []
    for _ in range(num_layers):
        layers.append({
            "ln1_g": jnp.ones((dim_model,), jnp.float32), "ln1_b": jnp.zeros((dim_model,), jnp.float32),
            "ln2_g": jnp.ones((dim_model,), jnp.float32), "ln2_b": jnp.zeros((dim_model,), jnp.float32),
            "ln3_g": jnp.ones((dim_model,), jnp.float32), "ln3_b": jnp.zeros((dim_model,), jnp.float32),
            "self_attn": attn_params(),
            "cross_attn": attn_params(),
            "w1": nrm((dim_ffn, dim_model), dim_model ** (-0.5)),
            "b1": jnp.zeros((dim_ffn,), jnp.float32),
            "w2": nrm((dim_model, dim_ffn), dim_ffn ** (-0.5)),
            "b2": jnp.zeros((dim_model,), jnp.float32),
        })

    # head: xavier-uniform weight, zero bias (matches reset_parameters)
    limit = math.sqrt(6.0 / (dim_model + vocab))
    head_w = jax.random.uniform(next(keys), (vocab, dim_model), jnp.float32, -limit, limit)

    return {
        "emb": emb,
        "layers": layers,
        "tail_g": jnp.ones((dim_model,), jnp.float32),
        "tail_b": jnp.zeros((dim_model,), jnp.float32),
        "head_w": head_w,
        "head_b": jnp.zeros((vocab,), jnp.float32),
    }


# ----------------------------------------------------------------------------
# Driver
# ----------------------------------------------------------------------------

if __name__ == "__main__":
    B, T, S = 2, 8, 16          # batch, tgt length, enc length
    D, H, F = 32, 4, 64         # dim_model, heads, ffn dim
    V = 16                      # out_channels (vocab)
    NUM_LAYERS = 2
    PAD = 0

    key = jax.random.PRNGKey(0)
    k_par, k_tgt, k_enc = jax.random.split(key, 3)

    params = init_params(k_par, V, D, H, F, NUM_LAYERS, PAD)
    prep = prepare_params(params, num_heads=H)

    # target token ids with some trailing padding in batch 0
    tgt_ids = jax.random.randint(k_tgt, (B, T), 1, V).astype(jnp.int32)
    tgt_ids = tgt_ids.at[0, -2:].set(PAD)
    tgt_key_padding_mask = (tgt_ids == PAD)                      # (B, T) bool, True == pad

    # encoder memory + padding mask
    enc_feature = jax.random.normal(k_enc, (B, S, D), jnp.float32)
    enc_key_padding_mask = jnp.zeros((B, S), bool).at[1, -3:].set(True)

    # additive float masks (as PyTorch would pass)
    tgt_causal_mask = jnp.where(jnp.triu(jnp.ones((T, T), bool), k=1), NEG_INF, 0.0)
    enc_tgt_causal_mask = jnp.zeros((T, S), jnp.float32)         # no memory mask

    logits = transformer_decoder_forward(
        prep, tgt_ids, enc_feature,
        tgt_causal_mask, enc_tgt_causal_mask,
        tgt_key_padding_mask, enc_key_padding_mask,
        num_heads=H,
    )
    logits = jax.block_until_ready(logits)
    assert logits.shape == (B, T, V) and logits.dtype == jnp.float32
    assert bool(jnp.all(jnp.isfinite(logits)))
    print("KERNEL_OK")
</pallas_src>

<mosaic_0001>
module attributes {stable_mosaic.version = 11 : i64} {
  func.func @_attn_block_kernel(%arg0: i32, %arg1: memref<1x8x32xbf16, #tpu.memory_space<vmem>>, %arg2: memref<1x16x32xbf16, #tpu.memory_space<vmem>>, %arg3: memref<1x32xf32, #tpu.memory_space<vmem>>, %arg4: memref<1x32xf32, #tpu.memory_space<vmem>>, %arg5: memref<32x96xbf16, #tpu.memory_space<vmem>>, %arg6: memref<1x96xf32, #tpu.memory_space<vmem>>, %arg7: memref<32x32xbf16, #tpu.memory_space<vmem>>, %arg8: memref<1x32xf32, #tpu.memory_space<vmem>>, %arg9: memref<1x32xf32, #tpu.memory_space<vmem>>, %arg10: memref<1x32xf32, #tpu.memory_space<vmem>>, %arg11: memref<32x32xbf16, #tpu.memory_space<vmem>>, %arg12: memref<1x32xf32, #tpu.memory_space<vmem>>, %arg13: memref<32x64xbf16, #tpu.memory_space<vmem>>, %arg14: memref<1x64xf32, #tpu.memory_space<vmem>>, %arg15: memref<32x32xbf16, #tpu.memory_space<vmem>>, %arg16: memref<1x32xf32, #tpu.memory_space<vmem>>, %arg17: memref<8x8xf32, #tpu.memory_space<vmem>>, %arg18: memref<1x1x8xf32, #tpu.memory_space<vmem>>, %arg19: memref<8x16xf32, #tpu.memory_space<vmem>>, %arg20: memref<1x1x16xf32, #tpu.memory_space<vmem>>, %arg21: memref<1x8x32xbf16, #tpu.memory_space<vmem>>, %arg22: memref<8x32xbf16, #tpu.memory_space<vmem>>) attributes {dimension_semantics = [#tpu.dimension_semantics<parallel>], iteration_bounds = array<i64: 2>, scalar_prefetch = 0 : i64, scratch_operands = 1 : i64, tpu.core_type = #tpu.core_type<tc>, window_params = [{transform_indices = @transform_0, window_bounds = array<i64: 1, 8, 32>}, {transform_indices = @transform_1, window_bounds = array<i64: 1, 16, 32>}, {pipeline_mode = #tpu.pipeline_mode<synchronous>, transform_indices = @transform_2, window_bounds = array<i64: 1, 32>}, {pipeline_mode = #tpu.pipeline_mode<synchronous>, transform_indices = @transform_3, window_bounds = array<i64: 1, 32>}, {pipeline_mode = #tpu.pipeline_mode<synchronous>, transform_indices = @transform_4, window_bounds = array<i64: 32, 96>}, {pipeline_mode = #tpu.pipeline_mode<synchronous>, transform_indices = @transform_5, window_bounds = array<i64: 1, 96>}, {pipeline_mode = #tpu.pipeline_mode<synchronous>, transform_indices = @transform_6, window_bounds = array<i64: 32, 32>}, {pipeline_mode = #tpu.pipeline_mode<synchronous>, transform_indices = @transform_7, window_bounds = array<i64: 1, 32>}, {pipeline_mode = #tpu.pipeline_mode<synchronous>, transform_indices = @transform_8, window_bounds = array<i64: 1, 32>}, {pipeline_mode = #tpu.pipeline_mode<synchronous>, transform_indices = @transform_9, window_bounds = array<i64: 1, 32>}, {pipeline_mode = #tpu.pipeline_mode<synchronous>, transform_indices = @transform_10, window_bounds = array<i64: 32, 32>}, {pipeline_mode = #tpu.pipeline_mode<synchronous>, transform_indices = @transform_11, window_bounds = array<i64: 1, 32>}, {pipeline_mode = #tpu.pipeline_mode<synchronous>, transform_indices = @transform_12, window_bounds = array<i64: 32, 64>}, {pipeline_mode = #tpu.pipeline_mode<synchronous>, transform_indices = @transform_13, window_bounds = array<i64: 1, 64>}, {pipeline_mode = #tpu.pipeline_mode<synchronous>, transform_indices = @transform_14, window_bounds = array<i64: 32, 32>}, {pipeline_mode = #tpu.pipeline_mode<synchronous>, transform_indices = @transform_15, window_bounds = array<i64: 1, 32>}, {pipeline_mode = #tpu.pipeline_mode<synchronous>, transform_indices = @transform_16, window_bounds = array<i64: 8, 8>}, {transform_indices = @transform_17, window_bounds = array<i64: 1, 1, 8>}, {pipeline_mode = #tpu.pipeline_mode<synchronous>, transform_indices = @transform_18, window_bounds = array<i64: 8, 16>}, {transform_indices = @transform_19, window_bounds = array<i64: 1, 1, 16>}, {transform_indices = @transform_20, window_bounds = array<i64: 1, 8, 32>}]} {
    %c0 = arith.constant 0 : index
    %c0_0 = arith.constant 0 : index
    %c0_1 = arith.constant 0 : index
    %0 = vector.load %arg1[%c0, %c0_0, %c0_1] : memref<1x8x32xbf16, #tpu.memory_space<vmem>>, vector<1x8x32xbf16>
    %1 = vector.shape_cast %0 : vector<1x8x32xbf16> to vector<8x32xbf16>
    %2 = arith.extf %1 : vector<8x32xbf16> to vector<8x32xf32>
    %c0_2 = arith.constant 0 : index
    %c0_3 = arith.constant 0 : index
    %3 = vector.load %arg3[%c0_2, %c0_3] : memref<1x32xf32, #tpu.memory_space<vmem>>, vector<1x32xf32>
    %c0_4 = arith.constant 0 : index
    %c0_5 = arith.constant 0 : index
    %4 = vector.load %arg4[%c0_4, %c0_5] : memref<1x32xf32, #tpu.memory_space<vmem>>, vector<1x32xf32>
    %cst = arith.constant dense<0.000000e+00> : vector<8xf32>
    %5 = vector.multi_reduction <add>, %2, %cst [1] : vector<8x32xf32> to vector<8xf32>
    %6 = vector.shape_cast %5 : vector<8xf32> to vector<8x1xf32>
    %cst_6 = arith.constant 3.200000e+01 : f32
    %7 = vector.broadcast %cst_6 : f32 to vector<8x1xf32>
    %8 = arith.divf %6, %7 : vector<8x1xf32>
    %9 = vector.broadcast %8 : vector<8x1xf32> to vector<8x32xf32>
    %10 = arith.subf %2, %9 : vector<8x32xf32>
    %11 = arith.mulf %10, %10 : vector<8x32xf32>
    %cst_7 = arith.constant dense<0.000000e+00> : vector<8xf32>
    %12 = vector.multi_reduction <add>, %11, %cst_7 [1] : vector<8x32xf32> to vector<8xf32>
    %13 = vector.shape_cast %12 : vector<8xf32> to vector<8x1xf32>
    %cst_8 = arith.constant 3.200000e+01 : f32
    %14 = vector.broadcast %cst_8 : f32 to vector<8x1xf32>
    %15 = arith.divf %13, %14 : vector<8x1xf32>
    %16 = vector.broadcast %8 : vector<8x1xf32> to vector<8x32xf32>
    %17 = arith.subf %2, %16 : vector<8x32xf32>
    %cst_9 = arith.constant 9.99999974E-6 : f32
    %18 = vector.broadcast %cst_9 : f32 to vector<8x1xf32>
    %19 = arith.addf %15, %18 : vector<8x1xf32>
    %20 = math.rsqrt %19 : vector<8x1xf32>
    %21 = vector.broadcast %20 : vector<8x1xf32> to vector<8x32xf32>
    %22 = arith.mulf %17, %21 : vector<8x32xf32>
    %23 = vector.broadcast %3 : vector<1x32xf32> to vector<8x32xf32>
    %24 = arith.mulf %22, %23 : vector<8x32xf32>
    %25 = vector.broadcast %4 : vector<1x32xf32> to vector<8x32xf32>
    %26 = arith.addf %24, %25 : vector<8x32xf32>
    %27 = arith.truncf %26 : vector<8x32xf32> to vector<8x32xbf16>
    %c0_10 = arith.constant 0 : index
    %c0_11 = arith.constant 0 : index
    %28 = vector.load %arg5[%c0_10, %c0_11] : memref<32x96xbf16, #tpu.memory_space<vmem>>, vector<32x96xbf16>
    %cst_12 = arith.constant dense<0.000000e+00> : vector<8x96xf32>
    %29 = tpu.matmul %27, %28, %cst_12 {dimension_numbers = #tpu.dot_dimension_numbers<[1], [0], [0], [1], [0, 0, 1, 1], [], []>} : vector<8x32xbf16>, vector<32x96xbf16>, vector<8x96xf32> -> vector<8x96xf32>
    %c0_13 = arith.constant 0 : index
    %c0_14 = arith.constant 0 : index
    %30 = vector.load %arg6[%c0_13, %c0_14] : memref<1x96xf32, #tpu.memory_space<vmem>>, vector<1x96xf32>
    %31 = vector.broadcast %30 : vector<1x96xf32> to vector<8x96xf32>
    %32 = arith.addf %29, %31 : vector<8x96xf32>
    %c0_15 = arith.constant 0 : index
    %c0_16 = arith.constant 0 : index
    %33 = vector.load %arg17[%c0_15, %c0_16] : memref<8x8xf32, #tpu.memory_space<vmem>>, vector<8x8xf32>
    %c0_17 = arith.constant 0 : index
    %c0_18 = arith.constant 0 : index
    %c0_19 = arith.constant 0 : index
    %34 = vector.load %arg18[%c0_17, %c0_18, %c0_19] : memref<1x1x8xf32, #tpu.memory_space<vmem>>, vector<1x1x8xf32>
    %35 = vector.shape_cast %34 : vector<1x1x8xf32> to vector<1x8xf32>
    %36 = vector.broadcast %35 : vector<1x8xf32> to vector<8x8xf32>
    %37 = arith.addf %33, %36 : vector<8x8xf32>
    %38 = vector.extract_strided_slice %32 {offsets = [0, 0], sizes = [8, 32], strides = [1, 1]} : vector<8x96xf32> to vector<8x32xf32>
    %39 = vector.extract_strided_slice %32 {offsets = [0, 32], sizes = [8, 32], strides = [1, 1]} : vector<8x96xf32> to vector<8x32xf32>
    %40 = vector.extract_strided_slice %32 {offsets = [0, 64], sizes = [8, 32], strides = [1, 1]} : vector<8x96xf32> to vector<8x32xf32>
    %41 = arith.truncf %38 : vector<8x32xf32> to vector<8x32xbf16>
    %42 = arith.truncf %39 : vector<8x32xf32> to vector<8x32xbf16>
    %43 = arith.truncf %40 : vector<8x32xf32> to vector<8x32xbf16>
    %44 = vector.extract_strided_slice %41 {offsets = [0, 0], sizes = [8, 8], strides = [1, 1]} : vector<8x32xbf16> to vector<8x8xbf16>
    %45 = vector.extract_strided_slice %42 {offsets = [0, 0], sizes = [8, 8], strides = [1, 1]} : vector<8x32xbf16> to vector<8x8xbf16>
    %cst_20 = arith.constant dense<0.000000e+00> : vector<8x8xf32>
    %46 = tpu.matmul %44, %45, %cst_20 {dimension_numbers = #tpu.dot_dimension_numbers<[1], [1], [0], [0], [0, 0, 1, 0], [], []>} : vector<8x8xbf16>, vector<8x8xbf16>, vector<8x8xf32> -> vector<8x8xf32>
    %47 = arith.addf %46, %37 : vector<8x8xf32>
    %cst_21 = arith.constant dense<0xFF800000> : vector<8xf32>
    %48 = vector.multi_reduction <maximumf>, %47, %cst_21 [1] : vector<8x8xf32> to vector<8xf32>
    %49 = vector.shape_cast %48 : vector<8xf32> to vector<8x1xf32>
    %50 = vector.broadcast %49 : vector<8x1xf32> to vector<8x8xf32>
    %51 = arith.subf %47, %50 : vector<8x8xf32>
    %52 = math.exp %51 : vector<8x8xf32>
    %cst_22 = arith.constant dense<0.000000e+00> : vector<8xf32>
    %53 = vector.multi_reduction <add>, %52, %cst_22 [1] : vector<8x8xf32> to vector<8xf32>
    %54 = vector.shape_cast %53 : vector<8xf32> to vector<8x1xf32>
    %55 = tpu.reciprocal %54 {approx = true} : vector<8x1xf32> -> vector<8x1xf32>
    %56 = vector.broadcast %55 : vector<8x1xf32> to vector<8x8xf32>
    %57 = arith.mulf %52, %56 : vector<8x8xf32>
    %58 = arith.truncf %57 : vector<8x8xf32> to vector<8x8xbf16>
    %59 = vector.extract_strided_slice %43 {offsets = [0, 0], sizes = [8, 8], strides = [1, 1]} : vector<8x32xbf16> to vector<8x8xbf16>
    %cst_23 = arith.constant dense<0.000000e+00> : vector<8x8xf32>
    %60 = tpu.matmul %58, %59, %cst_23 {dimension_numbers = #tpu.dot_dimension_numbers<[1], [0], [0], [1], [0, 0, 1, 1], [], []>} : vector<8x8xbf16>, vector<8x8xbf16>, vector<8x8xf32> -> vector<8x8xf32>
    %61 = arith.truncf %60 : vector<8x8xf32> to vector<8x8xbf16>
    %c0_24 = arith.constant 0 : index
    %c0_25 = arith.constant 0 : index
    %62 = vector.load %arg22[%c0_24, %c0_25] : memref<8x32xbf16, #tpu.memory_space<vmem>>, vector<8x8xbf16>
    tpu.vector_store %arg22[%c0_24, %c0_25], %61 {strides = array<i32>} : memref<8x32xbf16, #tpu.memory_space<vmem>>, vector<8x8xbf16>,
    %63 = vector.extract_strided_slice %41 {offsets = [0, 8], sizes = [8, 8], strides = [1, 1]} : vector<8x32xbf16> to vector<8x8xbf16>
    %64 = vector.extract_strided_slice %42 {offsets = [0, 8], sizes = [8, 8], strides = [1, 1]} : vector<8x32xbf16> to vector<8x8xbf16>
    %cst_26 = arith.constant dense<0.000000e+00> : vector<8x8xf32>
    %65 = tpu.matmul %63, %64, %cst_26 {dimension_numbers = #tpu.dot_dimension_numbers<[1], [1], [0], [0], [0, 0, 1, 0], [], []>} : vector<8x8xbf16>, vector<8x8xbf16>, vector<8x8xf32> -> vector<8x8xf32>
    %66 = arith.addf %65, %37 : vector<8x8xf32>
    %cst_27 = arith.constant dense<0xFF800000> : vector<8xf32>
    %67 = vector.multi_reduction <maximumf>, %66, %cst_27 [1] : vector<8x8xf32> to vector<8xf32>
    %68 = vector.shape_cast %67 : vector<8xf32> to vector<8x1xf32>
    %69 = vector.broadcast %68 : vector<8x1xf32> to vector<8x8xf32>
    %70 = arith.subf %66, %69 : vector<8x8xf32>
    %71 = math.exp %70 : vector<8x8xf32>
    %cst_28 = arith.constant dense<0.000000e+00> : vector<8xf32>
    %72 = vector.multi_reduction <add>, %71, %cst_28 [1] : vector<8x8xf32> to vector<8xf32>
    %73 = vector.shape_cast %72 : vector<8xf32> to vector<8x1xf32>
    %74 = tpu.reciprocal %73 {approx = true} : vector<8x1xf32> -> vector<8x1xf32>
    %75 = vector.broadcast %74 : vector<8x1xf32> to vector<8x8xf32>
    %76 = arith.mulf %71, %75 : vector<8x8xf32>
    %77 = arith.truncf %76 : vector<8x8xf32> to vector<8x8xbf16>
    %78 = vector.extract_strided_slice %43 {offsets = [0, 8], sizes = [8, 8], strides = [1, 1]} : vector<8x32xbf16> to vector<8x8xbf16>
    %cst_29 = arith.constant dense<0.000000e+00> : vector<8x8xf32>
    %79 = tpu.matmul %77, %78, %cst_29 {dimension_numbers = #tpu.dot_dimension_numbers<[1], [0], [0], [1], [0, 0, 1, 1], [], []>} : vector<8x8xbf16>, vector<8x8xbf16>, vector<8x8xf32> -> vector<8x8xf32>
    %80 = arith.truncf %79 : vector<8x8xf32> to vector<8x8xbf16>
    %c0_30 = arith.constant 0 : index
    %c8 = arith.constant 8 : index
    %81 = vector.load %arg22[%c0_30, %c8] : memref<8x32xbf16, #tpu.memory_space<vmem>>, vector<8x8xbf16>
    tpu.vector_store %arg22[%c0_30, %c8], %80 {strides = array<i32>} : memref<8x32xbf16, #tpu.memory_space<vmem>>, vector<8x8xbf16>,
    %82 = vector.extract_strided_slice %41 {offsets = [0, 16], sizes = [8, 8], strides = [1, 1]} : vector<8x32xbf16> to vector<8x8xbf16>
    %83 = vector.extract_strided_slice %42 {offsets = [0, 16], sizes = [8, 8], strides = [1, 1]} : vector<8x32xbf16> to vector<8x8xbf16>
    %cst_31 = arith.constant dense<0.000000e+00> : vector<8x8xf32>
    %84 = tpu.matmul %82, %83, %cst_31 {dimension_numbers = #tpu.dot_dimension_numbers<[1], [1], [0], [0], [0, 0, 1, 0], [], []>} : vector<8x8xbf16>, vector<8x8xbf16>, vector<8x8xf32> -> vector<8x8xf32>
    %85 = arith.addf %84, %37 : vector<8x8xf32>
    %cst_32 = arith.constant dense<0xFF800000> : vector<8xf32>
    %86 = vector.multi_reduction <maximumf>, %85, %cst_32 [1] : vector<8x8xf32> to vector<8xf32>
    %87 = vector.shape_cast %86 : vector<8xf32> to vector<8x1xf32>
    %88 = vector.broadcast %87 : vector<8x1xf32> to vector<8x8xf32>
    %89 = arith.subf %85, %88 : vector<8x8xf32>
    %90 = math.exp %89 : vector<8x8xf32>
    %cst_33 = arith.constant dense<0.000000e+00> : vector<8xf32>
    %91 = vector.multi_reduction <add>, %90, %cst_33 [1] : vector<8x8xf32> to vector<8xf32>
    %92 = vector.shape_cast %91 : vector<8xf32> to vector<8x1xf32>
    %93 = tpu.reciprocal %92 {approx = true} : vector<8x1xf32> -> vector<8x1xf32>
    %94 = vector.broadcast %93 : vector<8x1xf32> to vector<8x8xf32>
    %95 = arith.mulf %90, %94 : vector<8x8xf32>
    %96 = arith.truncf %95 : vector<8x8xf32> to vector<8x8xbf16>
    %97 = vector.extract_strided_slice %43 {offsets = [0, 16], sizes = [8, 8], strides = [1, 1]} : vector<8x32xbf16> to vector<8x8xbf16>
    %cst_34 = arith.constant dense<0.000000e+00> : vector<8x8xf32>
    %98 = tpu.matmul %96, %97, %cst_34 {dimension_numbers = #tpu.dot_dimension_numbers<[1], [0], [0], [1], [0, 0, 1, 1], [], []>} : vector<8x8xbf16>, vector<8x8xbf16>, vector<8x8xf32> -> vector<8x8xf32>
    %99 = arith.truncf %98 : vector<8x8xf32> to vector<8x8xbf16>
    %c0_35 = arith.constant 0 : index
    %c16 = arith.constant 16 : index
    %100 = vector.load %arg22[%c0_35, %c16] : memref<8x32xbf16, #tpu.memory_space<vmem>>, vector<8x8xbf16>
    tpu.vector_store %arg22[%c0_35, %c16], %99 {strides = array<i32>} : memref<8x32xbf16, #tpu.memory_space<vmem>>, vector<8x8xbf16>,
    %101 = vector.extract_strided_slice %41 {offsets = [0, 24], sizes = [8, 8], strides = [1, 1]} : vector<8x32xbf16> to vector<8x8xbf16>
    %102 = vector.extract_strided_slice %42 {offsets = [0, 24], sizes = [8, 8], strides = [1, 1]} : vector<8x32xbf16> to vector<8x8xbf16>
    %cst_36 = arith.constant dense<0.000000e+00> : vector<8x8xf32>
    %103 = tpu.matmul %101, %102, %cst_36 {dimension_numbers = #tpu.dot_dimension_numbers<[1], [1], [0], [0], [0, 0, 1, 0], [], []>} : vector<8x8xbf16>, vector<8x8xbf16>, vector<8x8xf32> -> vector<8x8xf32>
    %104 = arith.addf %103, %37 : vector<8x8xf32>
    %cst_37 = arith.constant dense<0xFF800000> : vector<8xf32>
    %105 = vector.multi_reduction <maximumf>, %104, %cst_37 [1] : vector<8x8xf32> to vector<8xf32>
    %106 = vector.shape_cast %105 : vector<8xf32> to vector<8x1xf32>
    %107 = vector.broadcast %106 : vector<8x1xf32> to vector<8x8xf32>
    %108 = arith.subf %104, %107 : vector<8x8xf32>
    %109 = math.exp %108 : vector<8x8xf32>
    %cst_38 = arith.constant dense<0.000000e+00> : vector<8xf32>
    %110 = vector.multi_reduction <add>, %109, %cst_38 [1] : vector<8x8xf32> to vector<8xf32>
    %111 = vector.shape_cast %110 : vector<8xf32> to vector<8x1xf32>
    %112 = tpu.reciprocal %111 {approx = true} : vector<8x1xf32> -> vector<8x1xf32>
    %113 = vector.broadcast %112 : vector<8x1xf32> to vector<8x8xf32>
    %114 = arith.mulf %109, %113 : vector<8x8xf32>
    %115 = arith.truncf %114 : vector<8x8xf32> to vector<8x8xbf16>
    %116 = vector.extract_strided_slice %43 {offsets = [0, 24], sizes = [8, 8], strides = [1, 1]} : vector<8x32xbf16> to vector<8x8xbf16>
    %cst_39 = arith.constant dense<0.000000e+00> : vector<8x8xf32>
    %117 = tpu.matmul %115, %116, %cst_39 {dimension_numbers = #tpu.dot_dimension_numbers<[1], [0], [0], [1], [0, 0, 1, 1], [], []>} : vector<8x8xbf16>, vector<8x8xbf16>, vector<8x8xf32> -> vector<8x8xf32>
    %118 = arith.truncf %117 : vector<8x8xf32> to vector<8x8xbf16>
    %c0_40 = arith.constant 0 : index
    %c24 = arith.constant 24 : index
    %119 = vector.load %arg22[%c0_40, %c24] : memref<8x32xbf16, #tpu.memory_space<vmem>>, vector<8x8xbf16>
    tpu.vector_store %arg22[%c0_40, %c24], %118 {strides = array<i32>} : memref<8x32xbf16, #tpu.memory_space<vmem>>, vector<8x8xbf16>,
    %c0_41 = arith.constant 0 : index
    %c0_42 = arith.constant 0 : index
    %120 = vector.load %arg22[%c0_41, %c0_42] : memref<8x32xbf16, #tpu.memory_space<vmem>>, vector<8x32xbf16>
    %c0_43 = arith.constant 0 : index
    %c0_44 = arith.constant 0 : index
    %121 = vector.load %arg7[%c0_43, %c0_44] : memref<32x32xbf16, #tpu.memory_space<vmem>>, vector<32x32xbf16>
    %cst_45 = arith.constant dense<0.000000e+00> : vector<8x32xf32>
    %122 = tpu.matmul %120, %121, %cst_45 {dimension_numbers = #tpu.dot_dimension_numbers<[1], [0], [0], [1], [0, 0, 1, 1], [], []>} : vector<8x32xbf16>, vector<32x32xbf16>, vector<8x32xf32> -> vector<8x32xf32>
    %123 = arith.addf %2, %122 : vector<8x32xf32>
    %c0_46 = arith.constant 0 : index
    %c0_47 = arith.constant 0 : index
    %124 = vector.load %arg8[%c0_46, %c0_47] : memref<1x32xf32, #tpu.memory_space<vmem>>, vector<1x32xf32>
    %125 = vector.broadcast %124 : vector<1x32xf32> to vector<8x32xf32>
    %126 = arith.addf %123, %125 : vector<8x32xf32>
    %c0_48 = arith.constant 0 : index
    %c0_49 = arith.constant 0 : index
    %127 = vector.load %arg9[%c0_48, %c0_49] : memref<1x32xf32, #tpu.memory_space<vmem>>, vector<1x32xf32>
    %c0_50 = arith.constant 0 : index
    %c0_51 = arith.constant 0 : index
    %128 = vector.load %arg10[%c0_50, %c0_51] : memref<1x32xf32, #tpu.memory_space<vmem>>, vector<1x32xf32>
    %cst_52 = arith.constant dense<0.000000e+00> : vector<8xf32>
    %129 = vector.multi_reduction <add>, %126, %cst_52 [1] : vector<8x32xf32> to vector<8xf32>
    %130 = vector.shape_cast %129 : vector<8xf32> to vector<8x1xf32>
    %cst_53 = arith.constant 3.200000e+01 : f32
    %131 = vector.broadcast %cst_53 : f32 to vector<8x1xf32>
    %132 = arith.divf %130, %131 : vector<8x1xf32>
    %133 = vector.broadcast %132 : vector<8x1xf32> to vector<8x32xf32>
    %134 = arith.subf %126, %133 : vector<8x32xf32>
    %135 = arith.mulf %134, %134 : vector<8x32xf32>
    %cst_54 = arith.constant dense<0.000000e+00> : vector<8xf32>
    %136 = vector.multi_reduction <add>, %135, %cst_54 [1] : vector<8x32xf32> to vector<8xf32>
    %137 = vector.shape_cast %136 : vector<8xf32> to vector<8x1xf32>
    %cst_55 = arith.constant 3.200000e+01 : f32
    %138 = vector.broadcast %cst_55 : f32 to vector<8x1xf32>
    %139 = arith.divf %137, %138 : vector<8x1xf32>
    %140 = vector.broadcast %132 : vector<8x1xf32> to vector<8x32xf32>
    %141 = arith.subf %126, %140 : vector<8x32xf32>
    %cst_56 = arith.constant 9.99999974E-6 : f32
    %142 = vector.broadcast %cst_56 : f32 to vector<8x1xf32>
    %143 = arith.addf %139, %142 : vector<8x1xf32>
    %144 = math.rsqrt %143 : vector<8x1xf32>
    %145 = vector.broadcast %144 : vector<8x1xf32> to vector<8x32xf32>
    %146 = arith.mulf %141, %145 : vector<8x32xf32>
    %147 = vector.broadcast %127 : vector<1x32xf32> to vector<8x32xf32>
    %148 = arith.mulf %146, %147 : vector<8x32xf32>
    %149 = vector.broadcast %128 : vector<1x32xf32> to vector<8x32xf32>
    %150 = arith.addf %148, %149 : vector<8x32xf32>
    %151 = arith.truncf %150 : vector<8x32xf32> to vector<8x32xbf16>
    %c0_57 = arith.constant 0 : index
    %c0_58 = arith.constant 0 : index
    %152 = vector.load %arg11[%c0_57, %c0_58] : memref<32x32xbf16, #tpu.memory_space<vmem>>, vector<32x32xbf16>
    %cst_59 = arith.constant dense<0.000000e+00> : vector<8x32xf32>
    %153 = tpu.matmul %151, %152, %cst_59 {dimension_numbers = #tpu.dot_dimension_numbers<[1], [0], [0], [1], [0, 0, 1, 1], [], []>} : vector<8x32xbf16>, vector<32x32xbf16>, vector<8x32xf32> -> vector<8x32xf32>
    %c0_60 = arith.constant 0 : index
    %c0_61 = arith.constant 0 : index
    %154 = vector.load %arg12[%c0_60, %c0_61] : memref<1x32xf32, #tpu.memory_space<vmem>>, vector<1x32xf32>
    %155 = vector.broadcast %154 : vector<1x32xf32> to vector<8x32xf32>
    %156 = arith.addf %153, %155 : vector<8x32xf32>
    %c0_62 = arith.constant 0 : index
    %c0_63 = arith.constant 0 : index
    %c0_64 = arith.constant 0 : index
    %157 = vector.load %arg2[%c0_62, %c0_63, %c0_64] : memref<1x16x32xbf16, #tpu.memory_space<vmem>>, vector<1x16x32xbf16>
    %158 = vector.shape_cast %157 : vector<1x16x32xbf16> to vector<16x32xbf16>
    %c0_65 = arith.constant 0 : index
    %c0_66 = arith.constant 0 : index
    %159 = vector.load %arg13[%c0_65, %c0_66] : memref<32x64xbf16, #tpu.memory_space<vmem>>, vector<32x64xbf16>
    %cst_67 = arith.constant dense<0.000000e+00> : vector<16x64xf32>
    %160 = tpu.matmul %158, %159, %cst_67 {dimension_numbers = #tpu.dot_dimension_numbers<[1], [0], [0], [1], [0, 0, 1, 1], [], []>} : vector<16x32xbf16>, vector<32x64xbf16>, vector<16x64xf32> -> vector<16x64xf32>
    %c0_68 = arith.constant 0 : index
    %c0_69 = arith.constant 0 : index
    %161 = vector.load %arg14[%c0_68, %c0_69] : memref<1x64xf32, #tpu.memory_space<vmem>>, vector<1x64xf32>
    %162 = vector.broadcast %161 : vector<1x64xf32> to vector<16x64xf32>
    %163 = arith.addf %160, %162 : vector<16x64xf32>
    %c0_70 = arith.constant 0 : index
    %c0_71 = arith.constant 0 : index
    %164 = vector.load %arg19[%c0_70, %c0_71] : memref<8x16xf32, #tpu.memory_space<vmem>>, vector<8x16xf32>
    %c0_72 = arith.constant 0 : index
    %c0_73 = arith.constant 0 : index
    %c0_74 = arith.constant 0 : index
    %165 = vector.load %arg20[%c0_72, %c0_73, %c0_74] : memref<1x1x16xf32, #tpu.memory_space<vmem>>, vector<1x1x16xf32>
    %166 = vector.shape_cast %165 : vector<1x1x16xf32> to vector<1x16xf32>
    %167 = vector.broadcast %166 : vector<1x16xf32> to vector<8x16xf32>
    %168 = arith.addf %164, %167 : vector<8x16xf32>
    %169 = vector.extract_strided_slice %163 {offsets = [0, 0], sizes = [16, 32], strides = [1, 1]} : vector<16x64xf32> to vector<16x32xf32>
    %170 = vector.extract_strided_slice %163 {offsets = [0, 32], sizes = [16, 32], strides = [1, 1]} : vector<16x64xf32> to vector<16x32xf32>
    %171 = arith.truncf %156 : vector<8x32xf32> to vector<8x32xbf16>
    %172 = arith.truncf %169 : vector<16x32xf32> to vector<16x32xbf16>
    %173 = arith.truncf %170 : vector<16x32xf32> to vector<16x32xbf16>
    %174 = vector.extract_strided_slice %171 {offsets = [0, 0], sizes = [8, 8], strides = [1, 1]} : vector<8x32xbf16> to vector<8x8xbf16>
    %175 = vector.extract_strided_slice %172 {offsets = [0, 0], sizes = [16, 8], strides = [1, 1]} : vector<16x32xbf16> to vector<16x8xbf16>
    %cst_75 = arith.constant dense<0.000000e+00> : vector<8x16xf32>
    %176 = tpu.matmul %174, %175, %cst_75 {dimension_numbers = #tpu.dot_dimension_numbers<[1], [1], [0], [0], [0, 0, 1, 0], [], []>} : vector<8x8xbf16>, vector<16x8xbf16>, vector<8x16xf32> -> vector<8x16xf32>
    %177 = arith.addf %176, %168 : vector<8x16xf32>
    %cst_76 = arith.constant dense<0xFF800000> : vector<8xf32>
    %178 = vector.multi_reduction <maximumf>, %177, %cst_76 [1] : vector<8x16xf32> to vector<8xf32>
    %179 = vector.shape_cast %178 : vector<8xf32> to vector<8x1xf32>
    %180 = vector.broadcast %179 : vector<8x1xf32> to vector<8x16xf32>
    %181 = arith.subf %177, %180 : vector<8x16xf32>
    %182 = math.exp %181 : vector<8x16xf32>
    %cst_77 = arith.constant dense<0.000000e+00> : vector<8xf32>
    %183 = vector.multi_reduction <add>, %182, %cst_77 [1] : vector<8x16xf32> to vector<8xf32>
    %184 = vector.shape_cast %183 : vector<8xf32> to vector<8x1xf32>
    %185 = tpu.reciprocal %184 {approx = true} : vector<8x1xf32> -> vector<8x1xf32>
    %186 = vector.broadcast %185 : vector<8x1xf32> to vector<8x16xf32>
    %187 = arith.mulf %182, %186 : vector<8x16xf32>
    %188 = arith.truncf %187 : vector<8x16xf32> to vector<8x16xbf16>
    %189 = vector.extract_strided_slice %173 {offsets = [0, 0], sizes = [16, 8], strides = [1, 1]} : vector<16x32xbf16> to vector<16x8xbf16>
    %cst_78 = arith.constant dense<0.000000e+00> : vector<8x8xf32>
    %190 = tpu.matmul %188, %189, %cst_78 {dimension_numbers = #tpu.dot_dimension_numbers<[1], [0], [0], [1], [0, 0, 1, 1], [], []>} : vector<8x16xbf16>, vector<16x8xbf16>, vector<8x8xf32> -> vector<8x8xf32>
    %191 = arith.truncf %190 : vector<8x8xf32> to vector<8x8xbf16>
    %c0_79 = arith.constant 0 : index
    %c0_80 = arith.constant 0 : index
    %192 = vector.load %arg22[%c0_79, %c0_80] : memref<8x32xbf16, #tpu.memory_space<vmem>>, vector<8x8xbf16>
    tpu.vector_store %arg22[%c0_79, %c0_80], %191 {strides = array<i32>} : memref<8x32xbf16, #tpu.memory_space<vmem>>, vector<8x8xbf16>,
    %193 = vector.extract_strided_slice %171 {offsets = [0, 8], sizes = [8, 8], strides = [1, 1]} : vector<8x32xbf16> to vector<8x8xbf16>
    %194 = vector.extract_strided_slice %172 {offsets = [0, 8], sizes = [16, 8], strides = [1, 1]} : vector<16x32xbf16> to vector<16x8xbf16>
    %cst_81 = arith.constant dense<0.000000e+00> : vector<8x16xf32>
    %195 = tpu.matmul %193, %194, %cst_81 {dimension_numbers = #tpu.dot_dimension_numbers<[1], [1], [0], [0], [0, 0, 1, 0], [], []>} : vector<8x8xbf16>, vector<16x8xbf16>, vector<8x16xf32> -> vector<8x16xf32>
    %196 = arith.addf %195, %168 : vector<8x16xf32>
    %cst_82 = arith.constant dense<0xFF800000> : vector<8xf32>
    %197 = vector.multi_reduction <maximumf>, %196, %cst_82 [1] : vector<8x16xf32> to vector<8xf32>
    %198 = vector.shape_cast %197 : vector<8xf32> to vector<8x1xf32>
    %199 = vector.broadcast %198 : vector<8x1xf32> to vector<8x16xf32>
    %200 = arith.subf %196, %199 : vector<8x16xf32>
    %201 = math.exp %200 : vector<8x16xf32>
    %cst_83 = arith.constant dense<0.000000e+00> : vector<8xf32>
    %202 = vector.multi_reduction <add>, %201, %cst_83 [1] : vector<8x16xf32> to vector<8xf32>
    %203 = vector.shape_cast %202 : vector<8xf32> to vector<8x1xf32>
    %204 = tpu.reciprocal %203 {approx = true} : vector<8x1xf32> -> vector<8x1xf32>
    %205 = vector.broadcast %204 : vector<8x1xf32> to vector<8x16xf32>
    %206 = arith.mulf %201, %205 : vector<8x16xf32>
    %207 = arith.truncf %206 : vector<8x16xf32> to vector<8x16xbf16>
    %208 = vector.extract_strided_slice %173 {offsets = [0, 8], sizes = [16, 8], strides = [1, 1]} : vector<16x32xbf16> to vector<16x8xbf16>
    %cst_84 = arith.constant dense<0.000000e+00> : vector<8x8xf32>
    %209 = tpu.matmul %207, %208, %cst_84 {dimension_numbers = #tpu.dot_dimension_numbers<[1], [0], [0], [1], [0, 0, 1, 1], [], []>} : vector<8x16xbf16>, vector<16x8xbf16>, vector<8x8xf32> -> vector<8x8xf32>
    %210 = arith.truncf %209 : vector<8x8xf32> to vector<8x8xbf16>
    %c0_85 = arith.constant 0 : index
    %c8_86 = arith.constant 8 : index
    %211 = vector.load %arg22[%c0_85, %c8_86] : memref<8x32xbf16, #tpu.memory_space<vmem>>, vector<8x8xbf16>
    tpu.vector_store %arg22[%c0_85, %c8_86], %210 {strides = array<i32>} : memref<8x32xbf16, #tpu.memory_space<vmem>>, vector<8x8xbf16>,
    %212 = vector.extract_strided_slice %171 {offsets = [0, 16], sizes = [8, 8], strides = [1, 1]} : vector<8x32xbf16> to vector<8x8xbf16>
    %213 = vector.extract_strided_slice %172 {offsets = [0, 16], sizes = [16, 8], strides = [1, 1]} : vector<16x32xbf16> to vector<16x8xbf16>
    %cst_87 = arith.constant dense<0.000000e+00> : vector<8x16xf32>
    %214 = tpu.matmul %212, %213, %cst_87 {dimension_numbers = #tpu.dot_dimension_numbers<[1], [1], [0], [0], [0, 0, 1, 0], [], []>} : vector<8x8xbf16>, vector<16x8xbf16>, vector<8x16xf32> -> vector<8x16xf32>
    %215 = arith.addf %214, %168 : vector<8x16xf32>
    %cst_88 = arith.constant dense<0xFF800000> : vector<8xf32>
    %216 = vector.multi_reduction <maximumf>, %215, %cst_88 [1] : vector<8x16xf32> to vector<8xf32>
    %217 = vector.shape_cast %216 : vector<8xf32> to vector<8x1xf32>
    %218 = vector.broadcast %217 : vector<8x1xf32> to vector<8x16xf32>
    %219 = arith.subf %215, %218 : vector<8x16xf32>
    %220 = math.exp %219 : vector<8x16xf32>
    %cst_89 = arith.constant dense<0.000000e+00> : vector<8xf32>
    %221 = vector.multi_reduction <add>, %220, %cst_89 [1] : vector<8x16xf32> to vector<8xf32>
    %222 = vector.shape_cast %221 : vector<8xf32> to vector<8x1xf32>
    %223 = tpu.reciprocal %222 {approx = true} : vector<8x1xf32> -> vector<8x1xf32>
    %224 = vector.broadcast %223 : vector<8x1xf32> to vector<8x16xf32>
    %225 = arith.mulf %220, %224 : vector<8x16xf32>
    %226 = arith.truncf %225 : vector<8x16xf32> to vector<8x16xbf16>
    %227 = vector.extract_strided_slice %173 {offsets = [0, 16], sizes = [16, 8], strides = [1, 1]} : vector<16x32xbf16> to vector<16x8xbf16>
    %cst_90 = arith.constant dense<0.000000e+00> : vector<8x8xf32>
    %228 = tpu.matmul %226, %227, %cst_90 {dimension_numbers = #tpu.dot_dimension_numbers<[1], [0], [0], [1], [0, 0, 1, 1], [], []>} : vector<8x16xbf16>, vector<16x8xbf16>, vector<8x8xf32> -> vector<8x8xf32>
    %229 = arith.truncf %228 : vector<8x8xf32> to vector<8x8xbf16>
    %c0_91 = arith.constant 0 : index
    %c16_92 = arith.constant 16 : index
    %230 = vector.load %arg22[%c0_91, %c16_92] : memref<8x32xbf16, #tpu.memory_space<vmem>>, vector<8x8xbf16>
    tpu.vector_store %arg22[%c0_91, %c16_92], %229 {strides = array<i32>} : memref<8x32xbf16, #tpu.memory_space<vmem>>, vector<8x8xbf16>,
    %231 = vector.extract_strided_slice %171 {offsets = [0, 24], sizes = [8, 8], strides = [1, 1]} : vector<8x32xbf16> to vector<8x8xbf16>
    %232 = vector.extract_strided_slice %172 {offsets = [0, 24], sizes = [16, 8], strides = [1, 1]} : vector<16x32xbf16> to vector<16x8xbf16>
    %cst_93 = arith.constant dense<0.000000e+00> : vector<8x16xf32>
    %233 = tpu.matmul %231, %232, %cst_93 {dimension_numbers = #tpu.dot_dimension_numbers<[1], [1], [0], [0], [0, 0, 1, 0], [], []>} : vector<8x8xbf16>, vector<16x8xbf16>, vector<8x16xf32> -> vector<8x16xf32>
    %234 = arith.addf %233, %168 : vector<8x16xf32>
    %cst_94 = arith.constant dense<0xFF800000> : vector<8xf32>
    %235 = vector.multi_reduction <maximumf>, %234, %cst_94 [1] : vector<8x16xf32> to vector<8xf32>
    %236 = vector.shape_cast %235 : vector<8xf32> to vector<8x1xf32>
    %237 = vector.broadcast %236 : vector<8x1xf32> to vector<8x16xf32>
    %238 = arith.subf %234, %237 : vector<8x16xf32>
    %239 = math.exp %238 : vector<8x16xf32>
    %cst_95 = arith.constant dense<0.000000e+00> : vector<8xf32>
    %240 = vector.multi_reduction <add>, %239, %cst_95 [1] : vector<8x16xf32> to vector<8xf32>
    %241 = vector.shape_cast %240 : vector<8xf32> to vector<8x1xf32>
    %242 = tpu.reciprocal %241 {approx = true} : vector<8x1xf32> -> vector<8x1xf32>
    %243 = vector.broadcast %242 : vector<8x1xf32> to vector<8x16xf32>
    %244 = arith.mulf %239, %243 : vector<8x16xf32>
    %245 = arith.truncf %244 : vector<8x16xf32> to vector<8x16xbf16>
    %246 = vector.extract_strided_slice %173 {offsets = [0, 24], sizes = [16, 8], strides = [1, 1]} : vector<16x32xbf16> to vector<16x8xbf16>
    %cst_96 = arith.constant dense<0.000000e+00> : vector<8x8xf32>
    %247 = tpu.matmul %245, %246, %cst_96 {dimension_numbers = #tpu.dot_dimension_numbers<[1], [0], [0], [1], [0, 0, 1, 1], [], []>} : vector<8x16xbf16>, vector<16x8xbf16>, vector<8x8xf32> -> vector<8x8xf32>
    %248 = arith.truncf %247 : vector<8x8xf32> to vector<8x8xbf16>
    %c0_97 = arith.constant 0 : index
    %c24_98 = arith.constant 24 : index
    %249 = vector.load %arg22[%c0_97, %c24_98] : memref<8x32xbf16, #tpu.memory_space<vmem>>, vector<8x8xbf16>
    tpu.vector_store %arg22[%c0_97, %c24_98], %248 {strides = array<i32>} : memref<8x32xbf16, #tpu.memory_space<vmem>>, vector<8x8xbf16>,
    %c0_99 = arith.constant 0 : index
    %c0_100 = arith.constant 0 : index
    %250 = vector.load %arg22[%c0_99, %c0_100] : memref<8x32xbf16, #tpu.memory_space<vmem>>, vector<8x32xbf16>
    %c0_101 = arith.constant 0 : index
    %c0_102 = arith.constant 0 : index
    %251 = vector.load %arg15[%c0_101, %c0_102] : memref<32x32xbf16, #tpu.memory_space<vmem>>, vector<32x32xbf16>
    %cst_103 = arith.constant dense<0.000000e+00> : vector<8x32xf32>
    %252 = tpu.matmul %250, %251, %cst_103 {dimension_numbers = #tpu.dot_dimension_numbers<[1], [0], [0], [1], [0, 0, 1, 1], [], []>} : vector<8x32xbf16>, vector<32x32xbf16>, vector<8x32xf32> -> vector<8x32xf32>
    %253 = arith.addf %126, %252 : vector<8x32xf32>
    %c0_104 = arith.constant 0 : index
    %c0_105 = arith.constant 0 : index
    %254 = vector.load %arg16[%c0_104, %c0_105] : memref<1x32xf32, #tpu.memory_space<vmem>>, vector<1x32xf32>
    %255 = vector.broadcast %254 : vector<1x32xf32> to vector<8x32xf32>
    %256 = arith.addf %253, %255 : vector<8x32xf32>
    %257 = arith.truncf %256 : vector<8x32xf32> to vector<8x32xbf16>
    %c0_106 = arith.constant 0 : index
    %c0_107 = arith.constant 0 : index
    %c0_108 = arith.constant 0 : index
    %258 = vector.load %arg21[%c0_106, %c0_107, %c0_108] : memref<1x8x32xbf16, #tpu.memory_space<vmem>>, vector<1x8x32xbf16>
    %259 = vector.shape_cast %258 : vector<1x8x32xbf16> to vector<8x32xbf16>
    %260 = vector.shape_cast %257 : vector<8x32xbf16> to vector<1x8x32xbf16>
    tpu.vector_store %arg21[%c0_106, %c0_107, %c0_108], %260 {strides = array<i32>} : memref<1x8x32xbf16, #tpu.memory_space<vmem>>, vector<1x8x32xbf16>,
    return
  }
  func.func @transform_0(%arg0: i32) -> (i32, i32, i32) {
    %c0_i32 = arith.constant 0 : i32
    %c0_i32_0 = arith.constant 0 : i32
    %c0_i32_1 = arith.constant 0 : i32
    return %arg0, %c0_i32, %c0_i32_0 : i32, i32, i32
  }
  func.func @transform_1(%arg0: i32) -> (i32, i32, i32) {
    %c0_i32 = arith.constant 0 : i32
    %c0_i32_0 = arith.constant 0 : i32
    %c0_i32_1 = arith.constant 0 : i32
    return %arg0, %c0_i32, %c0_i32_0 : i32, i32, i32
  }
  func.func @transform_2(%arg0: i32) -> (i32, i32) {
    %c0_i32 = arith.constant 0 : i32
    %c0_i32_0 = arith.constant 0 : i32
    %c0_i32_1 = arith.constant 0 : i32
    return %c0_i32, %c0_i32_0 : i32, i32
  }
  func.func @transform_3(%arg0: i32) -> (i32, i32) {
    %c0_i32 = arith.constant 0 : i32
    %c0_i32_0 = arith.constant 0 : i32
    %c0_i32_1 = arith.constant 0 : i32
    return %c0_i32, %c0_i32_0 : i32, i32
  }
  func.func @transform_4(%arg0: i32) -> (i32, i32) {
    %c0_i32 = arith.constant 0 : i32
    %c0_i32_0 = arith.constant 0 : i32
    %c0_i32_1 = arith.constant 0 : i32
    return %c0_i32, %c0_i32_0 : i32, i32
  }
  func.func @transform_5(%arg0: i32) -> (i32, i32) {
    %c0_i32 = arith.constant 0 : i32
    %c0_i32_0 = arith.constant 0 : i32
    %c0_i32_1 = arith.constant 0 : i32
    return %c0_i32, %c0_i32_0 : i32, i32
  }
  func.func @transform_6(%arg0: i32) -> (i32, i32) {
    %c0_i32 = arith.constant 0 : i32
    %c0_i32_0 = arith.constant 0 : i32
    %c0_i32_1 = arith.constant 0 : i32
    return %c0_i32, %c0_i32_0 : i32, i32
  }
  func.func @transform_7(%arg0: i32) -> (i32, i32) {
    %c0_i32 = arith.constant 0 : i32
    %c0_i32_0 = arith.constant 0 : i32
    %c0_i32_1 = arith.constant 0 : i32
    return %c0_i32, %c0_i32_0 : i32, i32
  }
  func.func @transform_8(%arg0: i32) -> (i32, i32) {
    %c0_i32 = arith.constant 0 : i32
    %c0_i32_0 = arith.constant 0 : i32
    %c0_i32_1 = arith.constant 0 : i32
    return %c0_i32, %c0_i32_0 : i32, i32
  }
  func.func @transform_9(%arg0: i32) -> (i32, i32) {
    %c0_i32 = arith.constant 0 : i32
    %c0_i32_0 = arith.constant 0 : i32
    %c0_i32_1 = arith.constant 0 : i32
    return %c0_i32, %c0_i32_0 : i32, i32
  }
  func.func @transform_10(%arg0: i32) -> (i32, i32) {
    %c0_i32 = arith.constant 0 : i32
    %c0_i32_0 = arith.constant 0 : i32
    %c0_i32_1 = arith.constant 0 : i32
    return %c0_i32, %c0_i32_0 : i32, i32
  }
  func.func @transform_11(%arg0: i32) -> (i32, i32) {
    %c0_i32 = arith.constant 0 : i32
    %c0_i32_0 = arith.constant 0 : i32
    %c0_i32_1 = arith.constant 0 : i32
    return %c0_i32, %c0_i32_0 : i32, i32
  }
  func.func @transform_12(%arg0: i32) -> (i32, i32) {
    %c0_i32 = arith.constant 0 : i32
    %c0_i32_0 = arith.constant 0 : i32
    %c0_i32_1 = arith.constant 0 : i32
    return %c0_i32, %c0_i32_0 : i32, i32
  }
  func.func @transform_13(%arg0: i32) -> (i32, i32) {
    %c0_i32 = arith.constant 0 : i32
    %c0_i32_0 = arith.constant 0 : i32
    %c0_i32_1 = arith.constant 0 : i32
    return %c0_i32, %c0_i32_0 : i32, i32
  }
  func.func @transform_14(%arg0: i32) -> (i32, i32) {
    %c0_i32 = arith.constant 0 : i32
    %c0_i32_0 = arith.constant 0 : i32
    %c0_i32_1 = arith.constant 0 : i32
    return %c0_i32, %c0_i32_0 : i32, i32
  }
  func.func @transform_15(%arg0: i32) -> (i32, i32) {
    %c0_i32 = arith.constant 0 : i32
    %c0_i32_0 = arith.constant 0 : i32
    %c0_i32_1 = arith.constant 0 : i32
    return %c0_i32, %c0_i32_0 : i32, i32
  }
  func.func @transform_16(%arg0: i32) -> (i32, i32) {
    %c0_i32 = arith.constant 0 : i32
    %c0_i32_0 = arith.constant 0 : i32
    %c0_i32_1 = arith.constant 0 : i32
    return %c0_i32, %c0_i32_0 : i32, i32
  }
  func.func @transform_17(%arg0: i32) -> (i32, i32, i32) {
    %c0_i32 = arith.constant 0 : i32
    %c0_i32_0 = arith.constant 0 : i32
    %c0_i32_1 = arith.constant 0 : i32
    return %arg0, %c0_i32, %c0_i32_0 : i32, i32, i32
  }
  func.func @transform_18(%arg0: i32) -> (i32, i32) {
    %c0_i32 = arith.constant 0 : i32
    %c0_i32_0 = arith.constant 0 : i32
    %c0_i32_1 = arith.constant 0 : i32
    return %c0_i32, %c0_i32_0 : i32, i32
  }
  func.func @transform_19(%arg0: i32) -> (i32, i32, i32) {
    %c0_i32 = arith.constant 0 : i32
    %c0_i32_0 = arith.constant 0 : i32
    %c0_i32_1 = arith.constant 0 : i32
    return %arg0, %c0_i32, %c0_i32_0 : i32, i32, i32
  }
  func.func @transform_20(%arg0: i32) -> (i32, i32, i32) {
    %c0_i32 = arith.constant 0 : i32
    %c0_i32_0 = arith.constant 0 : i32
    %c0_i32_1 = arith.constant 0 : i32
    return %arg0, %c0_i32, %c0_i32_0 : i32, i32, i32
  }
}

</mosaic_0001>

<bundles_post_ra>
// kernel: tpu_custom_call.1
= control target key start
LH: loop header
LB: loop body
LE: loop exit
PB: predicated region body
PF: predicated region fallthrough
CT: control target
= control target key end

     0   :  { %s4313_s0 = inlined_call_operand.hbm [shape: bf16[2,8,32], index: 0, kind: input, shape index: {}]   ;;  %s4314_s1 = inlined_call_operand.hbm [shape: bf16[2,16,32], index: 1, kind: input, shape index: {}]   ;;  %s4315_s2 = inlined_call_operand.hbm [shape: f32[1,32], index: 2, kind: input, shape index: {}]   ;;  %s4316_s3 = inlined_call_operand.hbm [shape: f32[1,32], index: 3, kind: input, shape index: {}]   ;;  %s4317_s4 = inlined_call_operand.hbm [shape: bf16[32,96], index: 4, kind: input, shape index: {}]   ;;  %s4318_s5 = inlined_call_operand.hbm [shape: f32[1,96], index: 5, kind: input, shape index: {}]   ;;  %s4319_s6 = inlined_call_operand.hbm [shape: bf16[32,32], index: 6, kind: input, shape index: {}]   ;;  %s4320_s7 = inlined_call_operand.hbm [shape: f32[1,32], index: 7, kind: input, shape index: {}]   ;;  %s4321_s8 = inlined_call_operand.hbm [shape: f32[1,32], index: 8, kind: input, shape index: {}]   ;;  %s4322_s9 = inlined_call_operand.hbm [shape: f32[1,32], index: 9, kind: input, shape index: {}]   ;;  %s4323_s10 = inlined_call_operand.vmem [shape: bf16[32,32], index: 10, kind: input, shape index: {}]   ;;  %s4324_s11 = inlined_call_operand.hbm [shape: f32[1,32], index: 11, kind: input, shape index: {}]   ;;  %s4325_s12 = inlined_call_operand.hbm [shape: bf16[32,64], index: 12, kind: input, shape index: {}]   ;;  %s4326_s13 = inlined_call_operand.hbm [shape: f32[1,64], index: 13, kind: input, shape index: {}]   ;;  %s4327_s14 = inlined_call_operand.hbm [shape: bf16[32,32], index: 14, kind: input, shape index: {}]   ;;  %s4328_s15 = inlined_call_operand.hbm [shape: f32[1,32], index: 15, kind: input, shape index: {}]   ;;  %s4329_s16 = inlined_call_operand.vmem [shape: f32[8,8], index: 16, kind: input, shape index: {}]   ;;  %s4330_s17 = inlined_call_operand.hbm [shape: f32[2,1,8], index: 17, kind: input, shape index: {}]   ;;  %s4331_s18 = inlined_call_operand.vmem [shape: f32[8,16], index: 18, kind: input, shape index: {}]   ;;  %s4332_s19 = inlined_call_operand.vmem [shape: f32[2,1,16], index: 19, kind: input, shape index: {}]   ;;  %s4333_s20 = inlined_call_operand.hbm [shape: bf16[2,8,32], index: 20, kind: output, shape index: {}]  }
   0x1   :  { %4348 = sst [smem:[#allocation44_spill]] %s4313_s0 }
   0x2   :  { %4349 = sst [smem:[#allocation45_spill]] %s4314_s1 }
   0x3   :  { %4350 = sst [smem:[#allocation46_spill]] %s4315_s2 }
   0x4   :  { %4351 = sst [smem:[#allocation47_spill]] %s4316_s3 }
   0x5   :  { %4352 = sst [smem:[#allocation48_spill]] %s4317_s4 }
   0x6   :  { %4353 = sst [smem:[#allocation49_spill]] %s4318_s5 }
   0x7   :  { %4354 = sst [smem:[#allocation50_spill]] %s4319_s6 }
   0x8   :  { %4355 = sst [smem:[#allocation51_spill]] %s4320_s7 }
   0x9   :  { %4356 = sst [smem:[#allocation52_spill]] %s4321_s8 }
   0xa   :  { %4357 = sst [smem:[#allocation53_spill]] %s4322_s9 }
   0xb   :  { %4358 = sst [smem:[#allocation54_spill]] %s4324_s11 }
   0xc   :  { %4359 = sst [smem:[#allocation55_spill]] %s4325_s12 }
   0xd   :  { %4360 = sst [smem:[#allocation56_spill]] %s4326_s13 }
   0xe   :  { %4361 = sst [smem:[#allocation57_spill]] %s4327_s14 }
   0xf   :  { %4362 = sst [smem:[#allocation58_spill]] %s4328_s15 }
  0x10   :  { %4363 = sst [smem:[#allocation59_spill]] %s4331_s18 }
  0x11   :  { %4364 = sst [smem:[#allocation60_spill]] %s4332_s19 }
  0x12   :  { %4365 = sst [smem:[#allocation61_spill]] %s4333_s20 }
  0x13   :  { %25 = vsyncpa [#allocation4], 0 }
  0x14   :  { %27 = vsyncpa [#allocation4 + $0x1], 0 }
  0x15   :  { %28 = vsyncpa [#allocation7], 0 }
  0x16   :  { %30 = vsyncpa [#allocation7 + $0x1], 0 }
  0x17   :  { %31 = vsyncpa [#allocation10], 0 }
  0x18   :  { %32 = vsyncpa [#allocation13], 0 }
  0x19   :  { %33 = vsyncpa [#allocation16], 0 }
  0x1a   :  { %34 = vsyncpa [#allocation19], 0 }
  0x1b   :  { %35 = vsyncpa [#allocation22], 0 }
  0x1c   :  { %36 = vsyncpa [#allocation25], 0 }
  0x1d   :  { %37 = vsyncpa [#allocation28], 0 }
  0x1e   :  { %39 = vsyncpa [#allocation28 + $0x1], 0 }
  0x1f   :  { %40 = vsyncpa [#allocation5], 0 }
  0x20   :  { %42 = vsyncpa [#allocation5 + $0x1], 0  ;;  %s3721_s1 = smov 0   ;;  %s3723_s22 = smov 0  }
  0x21   :  { %s3725_s23 = smov 0   ;;  %s3727_s24 = smov 0  }
  0x22 LB: > { %4366 = sst [smem:[#allocation41_spill]] %s3575_s23  ;;  %s3581_s2 = smov [#allocation8]   ;;  %s3579_s24 = sphi %s3727_s24, %s4418_s24   ;;  %s3575_s23 = sphi %s3725_s23, %s4420_s23   ;;  %s3571_s22 = sphi %s3723_s22, %s4422_s22   ;;  %s3567_s1 = sphi %s3721_s1, %s4421_s1  }
  0x23   : > { %s532_s25 = sshll.u32 %s3581_s2, 4  ;;  %s3742_s3 = sadd.s32 4294967295, %s3579_s24   ;;  %s533_s25 = int_to_ptr.vmem [resolvable:$true] %s532_s25 }
  0x24   : > { %p2524_p0 = scmp.ge.s32.totalorder %s3579_s24, 1  ;;  %p4337_p1 = scmp.eq.s32.totalorder %s3742_s3, 0 }
  0x25   : > { %p519_p2 = scmp.lt.s32.totalorder %s3579_s24, 3  ;;  %s3582_s27 = smov [#allocation9]  }
  0x26   : > { %s543_s28 = sshll.u32 %s3582_s27, 4  ;;  %s3583_s4 = smov [#allocation12]   ;;  %s3754_s28 = int_to_ptr.vmem [resolvable:$true] %s543_s28 }
  0x27   : > { %p3747_p3 = pnand %p2524_p0, %p519_p2  ;;  %s567_s29 = sshll.u32 %s3583_s4, 4  ;;  %s3762_s29 = int_to_ptr.vmem [resolvable:$true] %s567_s29 }
  0x28   : > { %s3584_s0 = smov [#allocation15]   ;;  %s3068_s27 = scalar_lea.vmem %s533_s25, 16 }
  0x29   : > { %s4367_s26 = scalar_select %p3747_p3, 1, 0 }
  0x2a   : > { %p2865_p5 = pneg %p3747_p3  ;;  %s3764_s21 = sshll.u32 %s3584_s0, 4  ;;  %s592_s21 = int_to_ptr.vmem [resolvable:$true] %s3764_s21 }
  0x2b   : > { %p3069_p8 = scmp.ne.s32.totalorder %s533_s25, %s3068_s27  ;;  %s3075_s4 = scalar_lea.vmem %s533_s25, 32 }
  0x2c   : > { %p3758_p6 = pnand %p2865_p5, %p4337_p1  ;;  %p3076_p11 = scmp.lt.s32.totalorder %s533_s25, %s533_s25 }
  0x2d   : > { %p3077_p12 = scmp.lt.s32.totalorder %s3075_s4, %s3068_s27 }
  0x2e   : > { %p3768_p7 = pneg %p3758_p6 }
  0x2f   : > { %p3078_p13 = por %p3077_p12, %p3076_p11 }
  0x30   : > { %p3071_p9 = pnand %p3069_p8, %p3768_p7 }
  0x32   : > { %p3072_p10 = pneg %p3071_p9 }
  0x34   : > { %p3079_p0 = pnand %p3078_p13, %p3072_p10 }
  0x36   : > { %3082 = shalt.err (!%p3079_p0)
}
  0x37   : > { %s4370_s18 = sld [smem:[#allocation46_spill]]  ;;  %s3094_s19 = scalar_lea.vmem %s3754_s28, 16 }
  0x38   : > { %p3095_p2 = scmp.ne.s32.totalorder %s3754_s28, %s3094_s19  ;;  %s3101_s27 = scalar_lea.vmem %s3754_s28, 32 }
  0x39   : > { %p3102_p9 = scmp.lt.s32.totalorder %s3754_s28, %s3754_s28  ;;  %p3103_p10 = scmp.lt.s32.totalorder %s3101_s27, %s3094_s19 }
  0x3a   : > { %p3097_p5 = pnand %p3095_p2, %p3768_p7 }
  0x3b   : > { %p3104_p11 = por %p3103_p10, %p3102_p9 }
  0x3c   : > { %p3098_p8 = pneg %p3097_p5 }
  0x3d   : > { %2868 = dma.hbm_to_vmem [thread:$0]  (!%p3758_p6), %s4370_s18, 16, %s533_s25, [#allocation7]  }
  0x3e   : > { %p3105_p12 = pnand %p3104_p11, %p3098_p8 }
  0x40   : > { %3108 = shalt.err (!%p3105_p12)
}
  0x41   : > { %s4371_s0 = sld [smem:[#allocation47_spill]]  ;;  %s3120_s18 = scalar_lea.vmem %s3762_s29, 16 }
  0x42   : > { %p3121_p13 = scmp.ne.s32.totalorder %s3762_s29, %s3120_s18  ;;  %s3127_s19 = scalar_lea.vmem %s3762_s29, 32 }
  0x43   : > { %p3128_p5 = scmp.lt.s32.totalorder %s3762_s29, %s3762_s29  ;;  %p3129_p8 = scmp.lt.s32.totalorder %s3127_s19, %s3120_s18 }
  0x44   : > { %p3123_p0 = pnand %p3121_p13, %p3768_p7 }
  0x45   : > { %p3130_p9 = por %p3129_p8, %p3128_p5 }
  0x46   : > { %p3124_p2 = pneg %p3123_p0 }
  0x47   : > { %2871 = dma.hbm_to_vmem [thread:$0]  (!%p3758_p6), %s4371_s0, 16, %s3754_s28, [#allocation10]  }
  0x48   : > { %p3131_p10 = pnand %p3130_p9, %p3124_p2 }
  0x4a   : > { %3134 = shalt.err (!%p3131_p10)
}
  0x4b   : > { %s4372_s5 = sld [smem:[#allocation49_spill]]  ;;  %s3585_s28 = smov [#allocation18]  }
  0x4c   : > { %s613_s20 = sshll.u32 %s3585_s28, 4  ;;  %s3146_s4 = scalar_lea.vmem %s592_s21, 16  ;;  %s614_s20 = int_to_ptr.vmem [resolvable:$true] %s613_s20 }
  0x4d   : > { %p3147_p11 = scmp.ne.s32.totalorder %s592_s21, %s3146_s4  ;;  %s3153_s0 = scalar_lea.vmem %s592_s21, 32 }
  0x4e   : > { %p3154_p0 = scmp.lt.s32.totalorder %s592_s21, %s592_s21  ;;  %p3155_p2 = scmp.lt.s32.totalorder %s3153_s0, %s3146_s4 }
  0x4f   : > { %p3149_p12 = pnand %p3147_p11, %p3768_p7 }
  0x50   : > { %p3156_p5 = por %p3155_p2, %p3154_p0 }
  0x51   : > { %2877 = dma.hbm_to_vmem [thread:$0]  (!%p3758_p6), %s4372_s5, 16, %s3762_s29, [#allocation13]  }
  0x52   : > { %p3150_p13 = pneg %p3149_p12 }
  0x54   : > { %p3157_p8 = pnand %p3156_p5, %p3150_p13 }
  0x56   : > { %3160 = shalt.err (!%p3157_p8)
}
  0x57   : > { %s4373_s7 = sld [smem:[#allocation51_spill]]  ;;  %s3172_s29 = scalar_lea.vmem %s614_s20, 16 }
  0x58   : > { %p3173_p9 = scmp.ne.s32.totalorder %s614_s20, %s3172_s29  ;;  %s3179_s25 = scalar_lea.vmem %s614_s20, 32 }
  0x59   : > { %p3180_p12 = scmp.lt.s32.totalorder %s614_s20, %s614_s20  ;;  %p3181_p4 = scmp.lt.s32.totalorder %s3179_s25, %s3172_s29 }
  0x5a   : > { %p3175_p10 = pnand %p3173_p9, %p3768_p7 }
  0x5b   : > { %p3182_p1 = por %p3181_p4, %p3180_p12 }
  0x5c   : > { %p3176_p11 = pneg %p3175_p10 }
  0x5d   : > { %2883 = dma.hbm_to_vmem [thread:$0]  (!%p3758_p6), %s4373_s7, 16, %s592_s21, [#allocation16]  }
  0x5e   : > { %p3183_p0 = pnand %p3182_p1, %p3176_p11 }
  0x60   : > { %3186 = shalt.err (!%p3183_p0)
}
  0x61   : > { %s4374_s9 = sld [smem:[#allocation53_spill]]  ;;  %s3586_s21 = smov [#allocation21]  }
  0x62   : > { %s637_s4 = sshll.u32 %s3586_s21, 4  ;;  %s3587_s0 = smov [#allocation24]   ;;  %s638_s4 = int_to_ptr.vmem [resolvable:$true] %s637_s4 }
  0x63   : > { %s661_s18 = sshll.u32 %s3587_s0, 4  ;;  %s3198_s19 = scalar_lea.vmem %s638_s4, 256  ;;  %s662_s18 = int_to_ptr.vmem [resolvable:$true] %s661_s18 }
  0x64   : > { %p3199_p13 = scmp.ne.s32.totalorder %s638_s4, %s3198_s19  ;;  %p3206_p4 = scmp.lt.s32.totalorder %s638_s4, %s638_s4 }
  0x65   : > { %p3207_p1 = scmp.lt.s32.totalorder %s3198_s19, %s3198_s19 }
  0x66   : > { %p3201_p2 = pnand %p3199_p13, %p3768_p7 }
  0x67   : > { %2889 = dma.hbm_to_vmem [thread:$0]  (!%p3758_p6), %s4374_s9, 16, %s614_s20, [#allocation19]  }
  0x68   : > { %p3202_p5 = pneg %p3201_p2  ;;  %p3208_p8 = por %p3207_p1, %p3206_p4 }
  0x6a   : > { %p3209_p9 = pnand %p3208_p8, %p3202_p5 }
  0x6c   : > { %3212 = shalt.err (!%p3209_p9)
}
  0x6d   : > { %s4338_s29 = smov 64   ;;  %s4339_s25 = smov 4  }
  0x6e   : > { %s4375_s12 = sld [smem:[#allocation55_spill]]  ;;  %s3224_s28 = scalar_lea.vmem %s662_s18, 256 }
  0x6f   : > { %p3225_p10 = scmp.ne.s32.totalorder %s662_s18, %s3224_s28  ;;  %p3232_p0 = scmp.lt.s32.totalorder %s662_s18, %s662_s18 }
  0x70   : > { %p3233_p13 = scmp.lt.s32.totalorder %s3224_s28, %s3224_s28 }
  0x71   : > { %p3227_p11 = pnand %p3225_p10, %p3768_p7 }
  0x72   : > { %p3234_p2 = por %p3233_p13, %p3232_p0 }
  0x73   : > { %p3228_p12 = pneg %p3227_p11 }
  0x74   : > { %2895 = dma.hbm_to_vmem [thread:$0]  (!%p3758_p6), %s4375_s12, 256, %s638_s4, [#allocation22], %s4338_s29, %s4338_s29, %s4339_s25  }
  0x75   : > { %p3235_p5 = pnand %p3234_p2, %p3228_p12 }
  0x77   : > { %3238 = shalt.err (!%p3235_p5)
}
  0x78   : > { %s4376_s14 = sld [smem:[#allocation57_spill]]  ;;  %s3590_s4 = smov [#allocation11]  }
  0x79   : > { %s553_s19 = sshll.u32 %s3590_s4, 4  ;;  %s3591_s20 = smov [#allocation14]   ;;  %s554_s19 = int_to_ptr.vmem [resolvable:$true] %s553_s19 }
  0x7a   : > { %s577_s27 = sshll.u32 %s3591_s20, 4  ;;  %s3250_s5 = scalar_lea.vmem %s554_s19, 256  ;;  %s578_s27 = int_to_ptr.vmem [resolvable:$true] %s577_s27 }
  0x7b   : > { %p3251_p4 = scmp.ne.s32.totalorder %s554_s19, %s3250_s5  ;;  %p3258_p9 = scmp.lt.s32.totalorder %s554_s19, %s554_s19 }
  0x7c   : > { %p3259_p10 = scmp.lt.s32.totalorder %s3250_s5, %s3250_s5 }
  0x7d   : > { %p3253_p1 = pnand %p3251_p4, %p3768_p7 }
  0x7e   : > { %2901 = dma.hbm_to_vmem [thread:$0]  (!%p3758_p6), %s4376_s14, 256, %s662_s18, [#allocation25], %s4338_s29, %s4338_s29, %s4339_s25  }
  0x7f   : > { %p3254_p8 = pneg %p3253_p1  ;;  %p3260_p11 = por %p3259_p10, %p3258_p9 }
  0x81   : > { %p3261_p12 = pnand %p3260_p11, %p3254_p8 }
  0x83   : > { %3264 = shalt.err (!%p3261_p12)
}
  0x84   : > { %s4377_s21 = sld [smem:[#allocation48_spill]]  ;;  %s3276_s0 = scalar_lea.vmem %s578_s27, 256 }
  0x85   : > { %p3277_p0 = scmp.ne.s32.totalorder %s578_s27, %s3276_s0  ;;  %p3284_p5 = scmp.lt.s32.totalorder %s578_s27, %s578_s27 }
  0x86   : > { %p3285_p4 = scmp.lt.s32.totalorder %s3276_s0, %s3276_s0 }
  0x87   : > { %p3279_p13 = pnand %p3277_p0, %p3768_p7 }
  0x88   : > { %p3286_p1 = por %p3285_p4, %p3284_p5 }
  0x89   : > { %p3280_p2 = pneg %p3279_p13 }
  0x8a   : > { %2874 = dma.hbm_to_vmem [thread:$0]  (!%p3758_p6), %s4377_s21, 256, %s554_s19, [#allocation10], %s4338_s29, %s4338_s29, %s4339_s25  }
  0x8b   : > { %p3287_p8 = pnand %p3286_p1, %p3280_p2 }
  0x8d   : > { %3290 = shalt.err (!%p3287_p8)
}
  0x8e   : > { %s4378_s6 = sld [smem:[#allocation50_spill]]  ;;  %s3592_s19 = smov [#allocation17]  }
  0x8f   : > { %s602_s20 = sshll.u32 %s3592_s19, 4  ;;  %s3593_s18 = smov [#allocation20]   ;;  %s603_s20 = int_to_ptr.vmem [resolvable:$true] %s602_s20 }
  0x90   : > { %s627_s28 = sshll.u32 %s3593_s18, 4  ;;  %s3302_s21 = scalar_lea.vmem %s603_s20, 16  ;;  %s628_s28 = int_to_ptr.vmem [resolvable:$true] %s627_s28 }
  0x91   : > { %p3303_p9 = scmp.ne.s32.totalorder %s603_s20, %s3302_s21  ;;  %s3309_s0 = scalar_lea.vmem %s603_s20, 32 }
  0x92   : > { %p3310_p12 = scmp.lt.s32.totalorder %s603_s20, %s603_s20  ;;  %p3311_p0 = scmp.lt.s32.totalorder %s3309_s0, %s3302_s21 }
  0x93   : > { %p3305_p10 = pnand %p3303_p9, %p3768_p7 }
  0x94   : > { %2880 = dma.hbm_to_vmem [thread:$0]  (!%p3758_p6), %s4378_s6, 256, %s578_s27, [#allocation13], %s4338_s29, %s4338_s29, %s4339_s25  }
  0x95   : > { %p3306_p11 = pneg %p3305_p10  ;;  %p3312_p13 = por %p3311_p0, %p3310_p12 }
  0x97   : > { %p3313_p2 = pnand %p3312_p13, %p3306_p11 }
  0x99   : > { %3316 = shalt.err (!%p3313_p2)
}
  0x9a   : > { %s4379_s8 = sld [smem:[#allocation52_spill]]  ;;  %s3328_s4 = scalar_lea.vmem %s628_s28, 16 }
  0x9b   : > { %p3329_p5 = scmp.ne.s32.totalorder %s628_s28, %s3328_s4  ;;  %s3335_s19 = scalar_lea.vmem %s628_s28, 32 }
  0x9c   : > { %p3336_p8 = scmp.lt.s32.totalorder %s628_s28, %s628_s28  ;;  %p3337_p9 = scmp.lt.s32.totalorder %s3335_s19, %s3328_s4 }
  0x9d   : > { %p3331_p4 = pnand %p3329_p5, %p3768_p7 }
  0x9e   : > { %p3338_p10 = por %p3337_p9, %p3336_p8 }
  0x9f   : > { %p3332_p1 = pneg %p3331_p4 }
  0xa0   : > { %2886 = dma.hbm_to_vmem [thread:$0]  (!%p3758_p6), %s4379_s8, 16, %s603_s20, [#allocation16]  }
  0xa1   : > { %p3339_p12 = pnand %p3338_p10, %p3332_p1 }
  0xa3   : > { %3342 = shalt.err (!%p3339_p12)
}
  0xa4   : > { %s4380_s11 = sld [smem:[#allocation54_spill]]  ;;  %s3594_s20 = smov [#allocation23]  }
  0xa5   : > { %s651_s0 = sshll.u32 %s3594_s20, 4  ;;  %s3595_s5 = smov [#allocation26]   ;;  %s652_s0 = int_to_ptr.vmem [resolvable:$true] %s651_s0 }
  0xa6   : > { %s675_s27 = sshll.u32 %s3595_s5, 4  ;;  %s3354_s29 = scalar_lea.vmem %s652_s0, 16  ;;  %s676_s27 = int_to_ptr.vmem [resolvable:$true] %s675_s27 }
  0xa7   : > { %p3355_p11 = scmp.ne.s32.totalorder %s652_s0, %s3354_s29  ;;  %s3361_s4 = scalar_lea.vmem %s652_s0, 32 }
  0xa8   : > { %p3362_p2 = scmp.lt.s32.totalorder %s652_s0, %s652_s0  ;;  %p3363_p5 = scmp.lt.s32.totalorder %s3361_s4, %s3354_s29 }
  0xa9   : > { %p3357_p0 = pnand %p3355_p11, %p3768_p7 }
  0xaa   : > { %2892 = dma.hbm_to_vmem [thread:$0]  (!%p3758_p6), %s4380_s11, 16, %s628_s28, [#allocation19]  }
  0xab   : > { %p3358_p13 = pneg %p3357_p0  ;;  %p3364_p4 = por %p3363_p5, %p3362_p2 }
  0xad   : > { %p3365_p1 = pnand %p3364_p4, %p3358_p13 }
  0xaf   : > { %3368 = shalt.err (!%p3365_p1)
}
  0xb0   : > { %s4381_s13 = sld [smem:[#allocation56_spill]]  ;;  %s3380_s18 = scalar_lea.vmem %s676_s27, 16 }
  0xb1   : > { %p3381_p8 = scmp.ne.s32.totalorder %s676_s27, %s3380_s18  ;;  %s3387_s21 = scalar_lea.vmem %s676_s27, 32 }
  0xb2   : > { %p3388_p12 = scmp.lt.s32.totalorder %s676_s27, %s676_s27  ;;  %p3389_p11 = scmp.lt.s32.totalorder %s3387_s21, %s3380_s18 }
  0xb3   : > { %p3383_p9 = pnand %p3381_p8, %p3768_p7 }
  0xb4   : > { %p3390_p0 = por %p3389_p11, %p3388_p12 }
  0xb5   : > { %p3384_p10 = pneg %p3383_p9 }
  0xb6   : > { %2898 = dma.hbm_to_vmem [thread:$0]  (!%p3758_p6), %s4381_s13, 16, %s652_s0, [#allocation22]  }
  0xb7   : > { %p3391_p2 = pnand %p3390_p0, %p3384_p10 }
  0xb9   : > { %3394 = shalt.err (!%p3391_p2)
}
  0xba   : > { %s4382_s15 = sld [smem:[#allocation58_spill]]  ;;  %s2523_s2 = sadd.s32 4294967294, %s3579_s24  }
  0xbb   : > { %s3890_s30 = sadd.s32 1, %s3579_s24   ;;  %s55_s0 = sadd.s32 1, %s3575_s23 }
  0xbc   : > { %4383 = sst [smem:[#allocation42_spill]] %s3890_s30  ;;  %s52_s5 = ssub.s32 %s3579_s24, %s3890_s30 }
  0xbd   : > { %p62_p7 = scmp.ne.s32.totalorder %s3575_s23, %s3571_s22  ;;  %p53_p13 = scmp.eq.s32.totalorder %s52_s5, 0 }
  0xbe   : > { %p63_p5 = scmp.eq.s32.totalorder %s3579_s24, 0  ;;  %p68_p4 = scmp.ne.s32.totalorder %s3571_s22, %s3567_s1 }
  0xbf   : > { %p506_p1 = scmp.eq.s32.totalorder %s3742_s3, 1  ;;  %p4385_p9 = scmp.eq.s32.totalorder %s3742_s3, 0 }
  0xc0   : > { %2904 = dma.hbm_to_vmem [thread:$0]  (!%p3758_p6), %s4382_s15, 16, %s676_s27, [#allocation25]  }
  0xc1   : > { %s3902_s4 = scalar_select %p53_p13, %s3575_s23, %s55_s0  }
  0xc2   : > { %p64_p8 = por %p63_p5, %p62_p7  ;;  %p3906_p10 = por %p4385_p9, %p68_p4 }
  0xc3   : > { %4384 = sst [smem:[#allocation43_spill]] %s3902_s4  ;;  %p3910_p6 = por %p506_p1, %p62_p7 }
  0xc4   : > { %s4386_s27 = scalar_select %p3906_p10, 1, 0 }
  0xc5   : > { %s4387_s19 = scalar_select %p3910_p6, 1, 0 }
  0xc6   : > { %p512_p12 = scmp.eq.s32.totalorder %s2523_s2, 1  ;;  %p2932_p11 = scmp.lt.s32.totalorder %s3579_s24, 2 }
  0xc7   : > { %s3916_s28 = sand.u32 1, %s3575_s23   ;;  %s2540_s29 = sshll.u32 %s3579_s24, 6 }
  0xc8   : > { %p3918_p0 = por %p512_p12, %p68_p4  ;;  %s2539_s21 = sshll.u32 %s3916_s28, 2 }
  0xc9   : > { %s4389_s5 = sld [smem:[#allocation44_spill]]  ;;  %s696_s2 = scalar_lea.vmem [#allocation3], %s2539_s21 }
  0xca   : > { %s4388_s18 = scalar_select %p3918_p0, 1, 0 }
  0xcb   : > { %s703_s6 = sshll.u32 %s696_s2, 4  ;;  %p3929_p2 = pnand %p2932_p11, %p64_p8  ;;  %s704_s6 = int_to_ptr.vmem [resolvable:$true] %s703_s6 }
  0xcc   : > { %s693_s9 = scalar_lea.sflag [#allocation4], %s3916_s28 }
  0xcd   : > { %p3939_p13 = pneg %p3929_p2 }
  0xcf   : > { %s3927_s25 = scalar_lea.hbm %s4389_s5, %s2540_s29  ;;  %s3400_s0 = scalar_lea.hbm %s4389_s5, 128 }
  0xd0   : > { %s3395_s11 = scalar_lea.hbm %s3927_s25, 64  ;;  %p3401_p1 = scmp.lt.s32.totalorder %s3927_s25, %s4389_s5 }
  0xd1   : > { %p3396_p7 = scmp.ne.s32.totalorder %s3927_s25, %s3395_s11  ;;  %p3402_p8 = scmp.lt.s32.totalorder %s3400_s0, %s3395_s11 }
  0xd3   : > { %p3398_p5 = pnand %p3939_p13, %p3396_p7  ;;  %p3403_p9 = por %p3402_p8, %p3401_p1 }
  0xd5   : > { %p3399_p4 = pneg %p3398_p5 }
  0xd7   : > { %p3404_p12 = pnand %p3403_p9, %p3399_p4 }
  0xd9   : > { %3407 = shalt.err (!%p3404_p12)
}
  0xda   : > { %s3408_s8 = scalar_lea.vmem %s704_s6, 64  ;;  %s3596_s13 = smov [#allocation3]  }
  0xdb   : > { %p3409_p11 = scmp.ne.s32.totalorder %s704_s6, %s3408_s8  ;;  %s3413_s14 = sshll.u32 %s3596_s13, 4  ;;  %s3414_s14 = int_to_ptr.vmem [resolvable:$false] %s3413_s14 }
  0xdc   : > { %s3415_s15 = scalar_lea.vmem %s3414_s14, 128  ;;  %p3416_p7 = scmp.lt.s32.totalorder %s704_s6, %s3414_s14 }
  0xdd   : > { %p3411_p0 = pnand %p3409_p11, %p3939_p13  ;;  %p3417_p5 = scmp.lt.s32.totalorder %s3415_s15, %s3408_s8 }
  0xdf   : > { %p3412_p6 = pneg %p3411_p0  ;;  %p3418_p10 = por %p3417_p5, %p3416_p7 }
  0xe1   : > { %p3419_p3 = pnand %p3418_p10, %p3412_p6 }
  0xe3   : > { %3422 = shalt.err (!%p3419_p3)
}
  0xe4   : > { %2908 = dma.hbm_to_vmem [thread:$0]  (!%p3929_p2), %s3927_s25, 64, %s704_s6, %s693_s9  }
  0xe5   : > { %s2541_s11 = sshll.u32 %s3916_s28, 3  ;;  %s2615_s12 = sshll.u32 %s3579_s24, 7 }
  0xe6   : > { %s4392_s13 = sld [smem:[#allocation45_spill]]  ;;  %s714_s8 = scalar_lea.vmem [#allocation6], %s2541_s11 }
  0xe7   : > { %s721_s14 = sshll.u32 %s714_s8, 4  ;;  %s4393_s15 = sand.u32 1, %s3579_s24   ;;  %s3964_s14 = int_to_ptr.vmem [resolvable:$true] %s721_s14 }
  0xe8   : > { %s711_s2 = scalar_lea.sflag [#allocation7], %s4393_s15 }
  0xec   : > { %s3962_s0 = scalar_lea.hbm %s4392_s13, %s2615_s12  ;;  %s3428_s25 = scalar_lea.hbm %s4392_s13, 256 }
  0xed   : > { %s3423_s5 = scalar_lea.hbm %s3962_s0, 128  ;;  %p3429_p0 = scmp.lt.s32.totalorder %s3962_s0, %s4392_s13 }
  0xee   : > { %p3424_p3 = scmp.ne.s32.totalorder %s3962_s0, %s3423_s5  ;;  %p3430_p4 = scmp.lt.s32.totalorder %s3428_s25, %s3423_s5 }
  0xf0   : > { %p3426_p10 = pnand %p3424_p3, %p3939_p13  ;;  %p3431_p1 = por %p3430_p4, %p3429_p0 }
  0xf2   : > { %p3427_p6 = pneg %p3426_p10 }
  0xf4   : > { %p3432_p8 = pnand %p3431_p1, %p3427_p6 }
  0xf6   : > { %3435 = shalt.err (!%p3432_p8)
}
  0xf7   : > { %s3436_s11 = scalar_lea.vmem %s3964_s14, 128  ;;  %s3597_s29 = smov [#allocation6]  }
  0xf8   : > { %p3437_p9 = scmp.ne.s32.totalorder %s3964_s14, %s3436_s11  ;;  %s3441_s8 = sshll.u32 %s3597_s29, 4  ;;  %s3442_s8 = int_to_ptr.vmem [resolvable:$false] %s3441_s8 }
  0xf9   : > { %s3443_s15 = scalar_lea.vmem %s3442_s8, 256  ;;  %p3444_p7 = scmp.lt.s32.totalorder %s3964_s14, %s3442_s8 }
  0xfa   : > { %p3439_p12 = pnand %p3437_p9, %p3939_p13  ;;  %p3445_p5 = scmp.lt.s32.totalorder %s3443_s15, %s3436_s11 }
  0xfc   : > { %p3440_p11 = pneg %p3439_p12  ;;  %p3446_p3 = por %p3445_p5, %p3444_p7 }
  0xfe   : > { %p3447_p10 = pnand %p3446_p3, %p3440_p11 }
 0x100   : > { %3450 = shalt.err (!%p3447_p10)
}
 0x101   : > { %s4394_s5 = smov 4   ;;  %s4395_s6 = smov 64  }
 0x102   : > { %2911 = dma.hbm_to_vmem [thread:$0]  (!%p3929_p2), %s3962_s0, 128, %s3964_s14, %s711_s2, %s4395_s6, %s4395_s6, %s4394_s5  }
 0x103   : > { %s2544_s9 = sshll.u32 %s3579_s24, 4  ;;  %s734_s25 = scalar_lea.vmem [#allocation27], %s3916_s28 }
 0x104   : > { %s741_s12 = sshll.u32 %s734_s25, 4  ;;  %s739_s29 = scalar_lea.hbm %s4330_s17, %s2544_s9  ;;  %s742_s12 = int_to_ptr.vmem [resolvable:$true] %s741_s12 }
 0x105   : > { %s732_s8 = scalar_lea.sflag [#allocation28], %s3916_s28  ;;  %s3451_s15 = scalar_lea.hbm %s739_s29, 16 }
 0x106   : > { %p3452_p6 = scmp.ne.s32.totalorder %s739_s29, %s3451_s15  ;;  %s3456_s23 = scalar_lea.hbm %s4330_s17, 32 }
 0x107   : > { %p3457_p1 = scmp.lt.s32.totalorder %s739_s29, %s4330_s17  ;;  %p3458_p8 = scmp.lt.s32.totalorder %s3456_s23, %s3451_s15 }
 0x108   : > { %p3454_p0 = pnand %p3452_p6, %p3939_p13 }
 0x109   : > { %p3459_p9 = por %p3458_p8, %p3457_p1 }
 0x10a   : > { %p3455_p4 = pneg %p3454_p0 }
 0x10c   : > { %p3460_p12 = pnand %p3459_p9, %p3455_p4 }
 0x10e   : > { %3463 = shalt.err (!%p3460_p12)
}
 0x10f   : > { %s3464_s14 = scalar_lea.vmem %s742_s12, 16  ;;  %s3598_s28 = smov [#allocation27]  }
 0x110   : > { %p3465_p11 = scmp.ne.s32.totalorder %s742_s12, %s3464_s14  ;;  %s3469_s2 = sshll.u32 %s3598_s28, 4  ;;  %s3470_s2 = int_to_ptr.vmem [resolvable:$false] %s3469_s2 }
 0x111   : > { %s3471_s5 = scalar_lea.vmem %s3470_s2, 32  ;;  %p3472_p3 = scmp.lt.s32.totalorder %s742_s12, %s3470_s2 }
 0x112   : > { %p3467_p7 = pnand %p3465_p11, %p3939_p13  ;;  %p3473_p10 = scmp.lt.s32.totalorder %s3471_s5, %s3464_s14 }
 0x114   : > { %p3468_p5 = pneg %p3467_p7  ;;  %p3474_p6 = por %p3473_p10, %p3472_p3 }
 0x116   : > { %p3475_p0 = pnand %p3474_p6, %p3468_p5 }
 0x118   : > { %3478 = shalt.err (!%p3475_p0)
}
 0x119   : > { %2914 = dma.hbm_to_vmem [thread:$0]  (!%p3929_p2), %s739_s29, 16, %s742_s12, %s732_s8  }
 0x11a   : > { %p4396_p4 = scmp.ne.s32.totalorder %s4367_s26, 0 }
 0x11b   : > { %s4012_s23 = sand.u32 (!%p4396_p4), 1, %s3571_s22   ;;  %p4397_p13 = scmp.ne.s32.totalorder (!%p4396_p4), %s4386_s27, 0 }
 0x11c   : > { %756 = sbr.rel (%p4396_p4) target bundleno = 3749 (0xea5), region = 100  ;;  %s2546_s30 = sshll.u32 (!%p4396_p4), %s4012_s23, 2 }
 0x11d   : > { %s759_s4 = scalar_lea.sflag (!%p4396_p4), [#allocation4], %s4012_s23  ;;  %s762_s20 = scalar_lea.vmem (!%p4396_p4), [#allocation3], %s2546_s30 }
 0x121   : > { %3522 = dma.done.wait (%p4397_p13), %s759_s4, 64  }
 0x122   : > { %3524 = vsyncadd (%p4397_p13), %s759_s4, 4294967232  ;;  %s767_s7 = sand.u32 1, %s3742_s3   ;;  %s2547_s26 = sshll.u32 %s4012_s23, 3 }
 0x123   : > { %s768_s13 = scalar_lea.sflag [#allocation7], %s767_s7  ;;  %s4024_s6 = scalar_lea.vmem [#allocation6], %s2547_s26 }
 0x124   : > { %3526 = dma.done.wait (%p4397_p13), %s768_s13, 128  }
 0x125   : > { %3528 = vsyncadd (%p4397_p13), %s768_s13, 4294967168  ;;  %p4398_p2 = scmp.eq.s32.totalorder %s3742_s3, 0 }
 0x127   : > { %3530 = dma.done.wait (%p4398_p2), [#allocation7], 16   ;;  %p4399_p1 = pmov %p4398_p2 }
 0x129   : > { %3532 = vsyncadd (%p4399_p1), [#allocation7], 4294967280  ;;  %p4400_p8 = pmov %p4399_p1 }
 0x12a   : > { %p4401_p9 = pmov %p4399_p1 }
 0x12b   : > { %3534 = dma.done.wait (%p4400_p8), [#allocation10], 272  }
 0x12c   : > { %3536 = vsyncadd (%p4401_p9), [#allocation10], 4294967024  ;;  %p4402_p12 = pmov %p4399_p1 }
 0x12d   : > { %p4403_p11 = pmov %p4399_p1 }
 0x12e   : > { %3538 = dma.done.wait (%p4402_p12), [#allocation13], 272  }
 0x12f   : > { %3540 = vsyncadd (%p4403_p11), [#allocation13], 4294967024  ;;  %p4404_p7 = pmov %p4399_p1 }
 0x130   : > { %p4405_p5 = pmov %p4399_p1 }
 0x131   : > { %3542 = dma.done.wait (%p4404_p7), [#allocation16], 32  }
 0x132   : > { %3544 = vsyncadd (%p4405_p5), [#allocation16], 4294967264  ;;  %p4406_p3 = pmov %p4399_p1 }
 0x133   : > { %p4407_p10 = pmov %p4399_p1 }
 0x134   : > { %3546 = dma.done.wait (%p4406_p3), [#allocation19], 32  }
 0x135   : > { %3548 = vsyncadd (%p4407_p10), [#allocation19], 4294967264  ;;  %p4408_p6 = pmov %p4399_p1 }
 0x136   : > { %p4409_p0 = pmov %p4399_p1 }
 0x137   : > { %3550 = dma.done.wait (%p4408_p6), [#allocation22], 272  }
 0x138   : > { %3552 = vsyncadd (%p4409_p0), [#allocation22], 4294967024  ;;  %p4410_p4 = pmov %p4409_p0 }
 0x139   : > { %p4411_p2 = pmov %p4409_p0 }
 0x13a   : > { %3554 = dma.done.wait (%p4410_p4), [#allocation25], 272  }
 0x13b   : > { %3556 = vsyncadd (%p4411_p2), [#allocation25], 4294967024  ;;  %s829_s9 = scalar_lea.sflag [#allocation28], %s4012_s23  ;;  %s831_s25 = scalar_lea.vmem [#allocation27], %s4012_s23 }
 0x13c   : > { %3558 = dma.done.wait (%p4397_p13), %s829_s9, 16  }
 0x13d   : > { %3560 = vsyncadd (%p4397_p13), %s829_s9, 4294967280  ;;  %vm908_vm0 = vcmask 261120   ;;  %v904_v0 = vld [vmem:[%s762_s20] sm:$0xf]  ;;  %v3599_v9 = vmov 0.0   ;;  %vm3600_vm1 = vmmov 0  }
 0x13e   : > { %v4064_v1 = vunpack.c.l.bf16 %v904_v0  ;;  %v3010_v8 = vld [vmem:[#allocation11 + $0x8] sm:$0xff]   ;;  %2669 = vmatprep.subr.bf16.mxu0 %v3599_v9  ;;  %2673 = vmatprep.mubr.msk.bf16.mxu0 %vm3600_vm1, %v3599_v9  ;;  %v3011_v10 = vld [vmem:[#allocation11] sm:$0xff]   ;;  %v2562_v15 = vld [vmem:[#allocation8] ss:$0 sm:$0xff]  ;;  %s3601_s27 = smov 120   ;;  %s3602_s12 = smov 96  }
 0x13f   : > { %2670 = vmatpush3.bf16.msra.mxu0 %v3010_v8  ;;  %2677 = vmatprep.subr.bf16.mxu1 %v3599_v9  ;;  %v2563_v17 = vld [vmem:[#allocation9] ss:$0 sm:$0xff]  ;;  %v2564_v21 = vld [vmem:[#allocation12] ss:$0 sm:$0xff]  ;;  %s3603_s21 = smov 88   ;;  %s3604_s11 = smov 80  }
 0x140   : > { %v909_v2 = vsel %vm908_vm0, %v4064_v1, 0.0  ;;  %2671 = vmatprep.subr.bf16.mxu0 %v3599_v9  ;;  %2679 = vmatprep.mubr.msk.bf16.mxu1 %vm3600_vm1, %v3599_v9  ;;  %s3605_s29 = smov 112   ;;  %s3606_s8 = smov 72   ;;  %vm1017_vm2 = vcmask 64512   ;;  %v1004_v39 = vld [vmem:[%s4329_s16] sm:$0xff]  ;;  %vm1081_vm3 = vcmask 1043456  }
 0x141   : > { %910 = vadd.xlane.f32.xlu0 %v909_v2  ;;  %s3607_s15 = smov 104   ;;  %v2568_v40 = vld [vmem:[%s831_s25] ss:$0 sm:$0xff]  ;;  %s3608_s28 = smov 64   ;;  %vm1126_vm4 = vcmask 60416   ;;  %vm1245_vm5 = vcmask 126016  }
 0x142   : > { %v1012_v41 = vadd.f32 %v2568_v40, %v1004_v39  ;;  %s3609_s2 = smov 56   ;;  %s3610_s5 = smov 48   ;;  %vm1364_vm6 = vcmask 191616   ;;  %vm1483_vm7 = vcmask 257216   ;;  %vm1781_vm8 = vcmask 130048  }
 0x143   : > { %2672 = vmatpush3.bf16.msra.mxu0 %v3011_v10  ;;  %s3611_s4 = smov 40   ;;  %s3612_s20 = smov 8   ;;  %vm2262_vm9 = vcmask 257024  }
 0x144   : > { %2683 = vmatprep.subr.bf16.mxu0 %v3599_v9  ;;  %s3613_s7 = smov 16   ;;  %s3614_s26 = smov 24  }
 0x145   : > { %p900_p13 = scmp.lt.s32.totalorder %s3742_s3, 1  ;;  %p4415_p8 = scmp.ne.s32.totalorder %s4387_s19, 0 }
 0x1ca   : > { %v911_v3 = vpop.xlane.xlu0 %910 }
 0x1cb   : > { %v913_v4 = vmul.f32 0.03125, %v911_v3 }
 0x1cd   : > { %v914_v5 = vsub.f32 %v4064_v1, %v913_v4 }
 0x1cf   : > { %v915_v6 = vmul.f32 %v914_v5, %v914_v5 }
 0x1d1   : > { %v916_v7 = vsel %vm908_vm0, %v915_v6, 0.0 }
 0x1d2   : > { %917 = vadd.xlane.f32.xlu0 %v916_v7 }
 0x25b   : > { %v918_v11 = vpop.xlane.xlu0 %917 }
 0x25c   : > { %v919_v12 = vmul.f32 0.03125, %v918_v11 }
 0x25e   : > { %v920_v13 = vadd.f32 1e-05, %v919_v12 }
 0x260   : > { %3021 = vrsqrt.f32 %v920_v13 }
 0x26d   : > { %v3022_v14 = vpop.eup %3021 }
 0x26e   : > { %v922_v16 = vmul.f32 %v3022_v14, %v914_v5 }
 0x270   : > { %v929_v18 = vmul.f32 %v2562_v15, %v922_v16 }
 0x272   : > { %v936_v19 = vadd.f32 %v2563_v17, %v929_v18 }
 0x274   : > { %v937_v20 = vpack.c.bf16 %v936_v19, %v936_v19 }
 0x276   : > { %2674 = vmatmul.mubr.msk.bf16.vlgmr.msra.gmra.mxu0 %vm908_vm0, %v937_v20 }
 0x277   : > { %2685 = vmatprep.mubr.msk.bf16.mxu0 %vm3600_vm1, %v3599_v9 }
 0x336   : > { %v998_v22 = vpop.f32.mrf.mxu0 }
 0x337   : > { %v999_v23 = vadd.f32 %v2564_v21, %v998_v22 }
 0x338   : > { %v2675_v24 = vpop.f32.mrf.mxu0 }
 0x339   : > { %v4081_v25 = vpack.c.bf16 %v999_v23, %v999_v23 }
 0x33a   : > { %v1001_v26 = vpop.f32.mrf.mxu0 }
 0x33b   : > { %1128 = vrot.lane.b32.xlu0 %v4081_v25, %s3601_s27  ;;  %1015 = vrot.lane.b32.xlu1 %v4081_v25, %s3602_s12 }
 0x33c   : > { %v2676_v27 = vpop.f32.mrf.mxu0 }
 0x33f   : > { %1130 = vrot.lane.b32.xlu1 %v4081_v25, %s3603_s21 }
 0x343   : > { %1249 = vrot.lane.b32.xlu1 %v4081_v25, %s3604_s11 }
 0x347   : > { %1247 = vrot.lane.b32.xlu1 %v4081_v25, %s3605_s29 }
 0x34b   : > { %1368 = vrot.lane.b32.xlu1 %v4081_v25, %s3606_s8 }
 0x34f   : > { %1366 = vrot.lane.b32.xlu1 %v4081_v25, %s3607_s15 }
 0x3ad   : > { %v1016_v28 = vpop.permute.xlu1 %1015  ;;  %v1129_v33 = vpop.permute.xlu0 %1128 }
 0x3ae   : > { %v1022_v29 = vsel %vm1017_vm2, %v1016_v28, 0 }
 0x3af   : > { %2678 = vmatpush3.bf16.xpose.msra.mxu1 %v1022_v29 }
 0x3b0   : > { %2689 = vmatprep.subr.bf16.mxu1 %v3599_v9 }
 0x3b1   : > { %v1131_v30 = vpop.permute.xlu1 %1130 }
 0x3b2   : > { %v1136_v31 = vsel %vm1017_vm2, %v1131_v30, 0 }
 0x3b5   : > { %v1250_v32 = vpop.permute.xlu1 %1249 }
 0x3b6   : > { %2680 = vmatmul.mubr.msk.bf16.vlgmr.msra.gmra.mxu1 %vm1017_vm2, %v4081_v25  ;;  %v1255_v35 = vsel %vm1017_vm2, %v1250_v32, 0 }
 0x3b7   : > { %2690 = vmatpush3.bf16.xpose.msra.mxu1 %v1136_v31  ;;  %2691 = vmatprep.mubr.msk.bf16.mxu1 %vm3600_vm1, %v3599_v9 }
 0x3b8   : > { %2701 = vmatprep.subr.bf16.mxu1 %v3599_v9 }
 0x3b9   : > { %v1248_v34 = vpop.permute.xlu1 %1247 }
 0x3bd   : > { %v1369_v36 = vpop.permute.xlu1 %1368 }
 0x3be   : > { %2692 = vmatmul.mubr.msk.bf16.vlgmr.msra.gmra.mxu1 %vm1017_vm2, %v1129_v33  ;;  %v1374_v37 = vsel %vm1017_vm2, %v1369_v36, 0 }
 0x3bf   : > { %2702 = vmatpush3.bf16.xpose.msra.mxu1 %v1255_v35  ;;  %2703 = vmatprep.mubr.msk.bf16.mxu1 %vm3600_vm1, %v3599_v9 }
 0x3c0   : > { %2713 = vmatprep.subr.bf16.mxu1 %v3599_v9 }
 0x3c1   : > { %v1367_v38 = vpop.permute.xlu1 %1366 }
 0x3c6   : > { %2704 = vmatmul.mubr.msk.bf16.vlgmr.msra.gmra.mxu1 %vm1017_vm2, %v1248_v34 }
 0x3c7   : > { %2714 = vmatpush3.bf16.xpose.msra.mxu1 %v1374_v37  ;;  %2715 = vmatprep.mubr.msk.bf16.mxu1 %vm3600_vm1, %v3599_v9 }
 0x3c8   : > { %2725 = vmatprep.subr.bf16.mxu1 %v3599_v9 }
 0x3ce   : > { %2716 = vmatmul.mubr.msk.bf16.vlgmr.msra.gmra.mxu1 %vm1017_vm2, %v1367_v38 }
 0x3cf   : > { %2729 = vmatprep.mubr.msk.bf16.mxu1 %vm3600_vm1, %v3599_v9 }
 0x476   : > { %v1058_v42 = vpop.f32.mrf.mxu1 }
 0x477   : > { %v1059_v43 = vadd.f32 %v1058_v42, %v1012_v41 }
 0x478   : > { %v2681_v44 = vpop.f32.mrf.mxu1 }
 0x479   : > { %v1064_v45 = vsel %vm1017_vm2, %v1059_v43, -inf }
 0x47a   : > { %1065 = vmax.xlane.f32.xlu1 %v1064_v45  ;;  %v1061_v46 = vpop.f32.mrf.mxu1 }
 0x47c   : > { %v2682_v47 = vpop.f32.mrf.mxu1 }
 0x47e   : > { %v1172_v48 = vpop.f32.mrf.mxu1 }
 0x47f   : > { %v1173_v49 = vadd.f32 %v1172_v48, %v1012_v41 }
 0x480   : > { %v2693_v50 = vpop.f32.mrf.mxu1 }
 0x481   : > { %v1178_v51 = vsel %vm1017_vm2, %v1173_v49, -inf }
 0x482   : > { %1179 = vmax.xlane.f32.xlu0 %v1178_v51  ;;  %v1175_v52 = vpop.f32.mrf.mxu1 }
 0x484   : > { %v2694_v53 = vpop.f32.mrf.mxu1 }
 0x486   : > { %v1291_v54 = vpop.f32.mrf.mxu1 }
 0x487   : > { %v1292_v55 = vadd.f32 %v1291_v54, %v1012_v41 }
 0x488   : > { %v2705_v56 = vpop.f32.mrf.mxu1 }
 0x489   : > { %v1297_v57 = vsel %vm1017_vm2, %v1292_v55, -inf }
 0x48a   : > { %1298 = vmax.xlane.f32.xlu1 %v1297_v57  ;;  %v1294_v58 = vpop.f32.mrf.mxu1 }
 0x48b   : > { %v3012_v58 = vld [vmem:[#allocation14 + $0x8] sm:$0xff]  }
 0x48c   : > { %v2706_v59 = vpop.f32.mrf.mxu1  ;;  %2726 = vmatpush3.bf16.msra.mxu1 %v3012_v58 }
 0x48d   : > { %2727 = vmatprep.subr.bf16.mxu1 %v3599_v9 }
 0x48e   : > { %v1410_v60 = vpop.f32.mrf.mxu1 }
 0x48f   : > { %v1411_v61 = vadd.f32 %v1410_v60, %v1012_v41  ;;  %v3013_v60 = vld [vmem:[#allocation14] sm:$0xff]  }
 0x490   : > { %v2717_v62 = vpop.f32.mrf.mxu1  ;;  %2728 = vmatpush3.bf16.msra.mxu1 %v3013_v60 }
 0x491   : > { %v1416_v63 = vsel %vm1017_vm2, %v1411_v61, -inf  ;;  %2741 = vmatprep.subr.bf16.mxu1 %v3599_v9 }
 0x492   : > { %1417 = vmax.xlane.f32.xlu0 %v1416_v63  ;;  %v1413_v0 = vpop.f32.mrf.mxu1 }
 0x494   : > { %v2718_v2 = vpop.f32.mrf.mxu1 }
 0x503   : > { %v1066_v3 = vpop.xlane.xlu1 %1065 }
 0x504   : > { %v1067_v4 = vsub.f32 %v1059_v43, %v1066_v3 }
 0x506   : > { %v1068_v5 = vmul.f32 1.442695, %v1067_v4 }
 0x508   : > { %3023 = vpow2.f32 %v1068_v5 }
 0x50b   : > { %v1180_v6 = vpop.xlane.xlu0 %1179 }
 0x50c   : > { %v1181_v7 = vsub.f32 %v1173_v49, %v1180_v6 }
 0x50e   : > { %v1182_v8 = vmul.f32 1.442695, %v1181_v7 }
 0x510   : > { %3025 = vpow2.f32 %v1182_v8 }
 0x513   : > { %v1299_v19 = vpop.xlane.xlu1 %1298 }
 0x514   : > { %v1300_v20 = vsub.f32 %v1292_v55, %v1299_v19 }
 0x515   : > { %v3024_v10 = vpop.eup %3023 }
 0x516   : > { %v1070_v11 = vsel %vm1017_vm2, %v3024_v10, 0.0  ;;  %v1301_v21 = vmul.f32 1.442695, %v1300_v20 }
 0x517   : > { %1071 = vadd.xlane.f32.xlu1 %v1070_v11 }
 0x51b   : > { %v1418_v12 = vpop.xlane.xlu0 %1417 }
 0x51c   : > { %v1419_v13 = vsub.f32 %v1411_v61, %v1418_v12 }
 0x51d   : > { %v3026_v14 = vpop.eup %3025 }
 0x51e   : > { %v1420_v15 = vmul.f32 1.442695, %v1419_v13  ;;  %v1184_v16 = vsel %vm1017_vm2, %v3026_v14, 0.0  ;;  %v2583_v13 = vld [vmem:[#allocation15] ss:$0 sm:$0xff] }
 0x51f   : > { %1185 = vadd.xlane.f32.xlu0 %v1184_v16 }
 0x520   : > { %3027 = vpow2.f32 %v1420_v15 }
 0x521   : > { %3029 = vpow2.f32 %v1301_v21 }
 0x528   : > { %1076 = vrot.lane.b32.xlu1 %v4081_v25, %s3608_s28 }
 0x52d   : > { %v3028_v17 = vpop.eup %3027 }
 0x52e   : > { %v1422_v18 = vsel %vm1017_vm2, %v3028_v17, 0.0  ;;  %v3030_v22 = vpop.eup %3029 }
 0x52f   : > { %1423 = vadd.xlane.f32.xlu0 %v1422_v18  ;;  %v1303_v23 = vsel %vm1017_vm2, %v3030_v22, 0.0 }
 0x545   : > { %1190 = vrot.lane.b32.xlu0 %v4081_v25, %s3609_s2 }
 0x54c   : > { %1304 = vadd.xlane.f32.xlu1 %v1303_v23 }
 0x55d   : > { %1309 = vrot.lane.b32.xlu1 %v4081_v25, %s3610_s5  ;;  %s4413_s5 = sld [smem:[#allocation59_spill]] }
 0x561   : > { %1428 = vrot.lane.b32.xlu1 %v4081_v25, %s3611_s4 }
 0x5a0   : > { %v1072_v24 = vpop.xlane.xlu1 %1071 }
 0x5a1   : > { %3031 = vrcp.f32 %v1072_v24 }
 0x5a4   : > { %v1077_v26 = vpop.permute.xlu1 %1076 }
 0x5a5   : > { %v1083_v27 = vsel %vm1081_vm3, %v1077_v26, 0  ;;  %v3014_v26 = vld [vmem:[#allocation21 + $0x8] sm:$0xff]  }
 0x5a6   : > { %2684 = vmatpush3.bf16.msra.mxu0 %v1083_v27  ;;  %v3016_v27 = vld [vmem:[%s4024_s6] sm:$0xff]   ;;  %s901_s6 = scalar_select %p900_p13, %s3742_s3, 1 }
 0x5a7   : > { %2695 = vmatprep.subr.bf16.mxu0 %v3599_v9 }
 0x5a8   : > { %v1186_v28 = vpop.xlane.xlu0 %1185 }
 0x5a9   : > { %3033 = vrcp.f32 %v1186_v28  ;;  %v3017_v28 = vld [vmem:[%s4323_s10 + $0x8] sm:$0xff]  }
 0x5ae   : > { %v3032_v29 = vpop.eup %3031 }
 0x5af   : > { %v1074_v30 = vmul.f32 %v3032_v29, %v3024_v10  ;;  %v3018_v29 = vld [vmem:[%s4323_s10] sm:$0xff]  }
 0x5b1   : > { %v1075_v31 = vpack.c.bf16 %v1074_v30, %v1074_v30 }
 0x5b3   : > { %2686 = vmatmul.mubr.msk.bf16.vlgmr.msra.gmra.mxu0 %vm1017_vm2, %v1075_v31 }
 0x5b4   : > { %2697 = vmatprep.mubr.msk.bf16.mxu0 %vm3600_vm1, %v3599_v9 }
 0x5b6   : > { %v3034_v25 = vpop.eup %3033 }
 0x5b7   : > { %v1188_v33 = vmul.f32 %v3034_v25, %v3026_v14 }
 0x5b8   : > { %v1424_v32 = vpop.xlane.xlu0 %1423 }
 0x5b9   : > { %v1189_v36 = vpack.c.bf16 %v1188_v33, %v1188_v33  ;;  %v2584_v33 = vld [vmem:[#allocation17] ss:$0 sm:$0xff] }
 0x5bc   : > { %v1191_v34 = vpop.permute.xlu0 %1190 }
 0x5bd   : > { %v1196_v35 = vsel %vm1081_vm3, %v1191_v34, 0 }
 0x5be   : > { %2696 = vmatpush3.bf16.msra.mxu0 %v1196_v35  ;;  %v2585_v35 = vld [vmem:[#allocation18] ss:$0 sm:$0xff] }
 0x5bf   : > { %2707 = vmatprep.subr.bf16.mxu0 %v3599_v9 }
 0x5c1   : > { %2698 = vmatmul.mubr.msk.bf16.vlgmr.msra.gmra.mxu0 %vm1017_vm2, %v1189_v36 }
 0x5c2   : > { %2709 = vmatprep.mubr.msk.bf16.mxu0 %vm3600_vm1, %v3599_v9 }
 0x5d5   : > { %v1305_v37 = vpop.xlane.xlu1 %1304 }
 0x5d6   : > { %3035 = vrcp.f32 %v1305_v37 }
 0x5d7   : > { %3037 = vrcp.f32 %v1424_v32 }
 0x5d9   : > { %v1310_v38 = vpop.permute.xlu1 %1309 }
 0x5da   : > { %v1315_v39 = vsel %vm1081_vm3, %v1310_v38, 0 }
 0x5db   : > { %2708 = vmatpush3.bf16.msra.mxu0 %v1315_v39  ;;  %v2590_v39 = vld [vmem:[#allocation23] ss:$0 sm:$0xff] }
 0x5dc   : > { %2719 = vmatprep.subr.bf16.mxu0 %v3599_v9 }
 0x5dd   : > { %v1429_v42 = vpop.permute.xlu1 %1428 }
 0x5de   : > { %v1434_v45 = vsel %vm1081_vm3, %v1429_v42, 0 }
 0x5e3   : > { %v3036_v40 = vpop.eup %3035 }
 0x5e4   : > { %v1307_v41 = vmul.f32 %v3036_v40, %v3030_v22  ;;  %v3038_v44 = vpop.eup %3037 }
 0x5e5   : > { %v1426_v46 = vmul.f32 %v3038_v44, %v3028_v17 }
 0x5e6   : > { %v1308_v43 = vpack.c.bf16 %v1307_v41, %v1307_v41 }
 0x5e7   : > { %v1427_v47 = vpack.c.bf16 %v1426_v46, %v1426_v46 }
 0x5e8   : > { %2710 = vmatmul.mubr.msk.bf16.vlgmr.msra.gmra.mxu0 %vm1017_vm2, %v1308_v43 }
 0x5e9   : > { %2720 = vmatpush3.bf16.msra.mxu0 %v1434_v45  ;;  %2721 = vmatprep.mubr.msk.bf16.mxu0 %vm3600_vm1, %v3599_v9 }
 0x5ea   : > { %2733 = vmatprep.subr.bf16.mxu0 %v3599_v9 }
 0x5f0   : > { %2722 = vmatmul.mubr.msk.bf16.vlgmr.msra.gmra.mxu0 %vm1017_vm2, %v1427_v47 }
 0x5f1   : > { %2737 = vmatprep.mubr.msk.bf16.mxu0 %vm3600_vm1, %v3599_v9  ;;  %2734 = vmatpush3.bf16.msra.mxu0 %v3017_v28 }
 0x5f2   : > { %2735 = vmatprep.subr.bf16.mxu0 %v3599_v9 }
 0x5f5   : > { %2736 = vmatpush3.bf16.msra.mxu0 %v3018_v29 }
 0x5f6   : > { %2749 = vmatprep.subr.bf16.mxu0 %v3599_v9 }
 0x673   : > { %v1119_v48 = vpop.f32.mrf.mxu0 }
 0x674   : > { %v1125_v49 = vpack.c.bf16 %v1119_v48, %v1119_v48  ;;  %v2586_v48 = vld [vmem:[#allocation20] ss:$0 sm:$0xff] }
 0x675   : > { %v2687_v50 = vpop.f32.mrf.mxu0 }
 0x676   : > { %1127 = vst.msk [vmem:[#allocation2] sm:$0xf] %vm1126_vm4, %v1125_v49 }
 0x677   : > { %v1122_v51 = vpop.f32.mrf.mxu0 }
 0x679   : > { %v2688_v52 = vpop.f32.mrf.mxu0 }
 0x681   : > { %v1232_v53 = vpop.f32.mrf.mxu0 }
 0x682   : > { %v2616_v54 = vpack.c.bf16 %v1232_v53, %v1232_v53 }
 0x683   : > { %v2699_v55 = vpop.f32.mrf.mxu0 }
 0x684   : > { %1242 = vrot.lane.b32.xlu0 %v2616_v54, %s3612_s20 }
 0x685   : > { %v1235_v56 = vpop.f32.mrf.mxu0 }
 0x687   : > { %v2700_v57 = vpop.f32.mrf.mxu0 }
 0x6a8   : > { %v1351_v59 = vpop.f32.mrf.mxu0 }
 0x6a9   : > { %v2617_v61 = vpack.c.bf16 %v1351_v59, %v1351_v59 }
 0x6aa   : > { %v2711_v62 = vpop.f32.mrf.mxu0 }
 0x6ab   : > { %1361 = vrot.lane.b32.xlu1 %v2617_v61, %s3613_s7 }
 0x6ac   : > { %v1354_v63 = vpop.f32.mrf.mxu0 }
 0x6ae   : > { %v2712_v0 = vpop.f32.mrf.mxu0 }
 0x6af   : > { %v1724_v0 = vld [vmem:[%s4413_s5] sm:$0xff] }
 0x6b0   : > { %v1470_v2 = vpop.f32.mrf.mxu0 }
 0x6b1   : > { %v2618_v3 = vpack.c.bf16 %v1470_v2, %v1470_v2 }
 0x6b2   : > { %v2723_v4 = vpop.f32.mrf.mxu0 }
 0x6b3   : > { %1480 = vrot.lane.b32.xlu0 %v2618_v3, %s3614_s26 }
 0x6b4   : > { %v1473_v5 = vpop.f32.mrf.mxu0 }
 0x6b6   : > { %v2724_v6 = vpop.f32.mrf.mxu0 }
 0x6f6   : > { %v1243_v7 = vpop.permute.xlu0 %1242 }
 0x6f7   : > { %1246 = vst.msk [vmem:[#allocation2] sm:$0xf] %vm1245_vm5, %v1243_v7 }
 0x71d   : > { %v1362_v8 = vpop.permute.xlu1 %1361 }
 0x71e   : > { %1365 = vst.msk [vmem:[#allocation2] sm:$0xf] %vm1364_vm6, %v1362_v8 }
 0x725   : > { %v1481_v10 = vpop.permute.xlu0 %1480 }
 0x726   : > { %1484 = vst.msk [vmem:[#allocation2] sm:$0xf] %vm1483_vm7, %v1481_v10 }
 0x72d   : > { %v1485_v11 = vld [vmem:[#allocation2] sm:$0xf] }
 0x72e   : > { %2730 = vmatmul.mubr.msk.bf16.vlgmr.msra.gmra.mxu1 %vm908_vm0, %v1485_v11 }
 0x72f   : > { %2745 = vmatprep.mubr.msk.bf16.mxu1 %vm3600_vm1, %v3599_v9  ;;  %2742 = vmatpush3.bf16.msra.mxu1 %v3014_v26 }
 0x730   : > { %2743 = vmatprep.subr.bf16.mxu1 %v3599_v9 }
 0x7ee   : > { %v1539_v12 = vpop.f32.mrf.mxu1 }
 0x7ef   : > { %v1545_v14 = vadd.f32 %v1539_v12, %v4064_v1  ;;  %v3015_v1 = vld [vmem:[#allocation21] sm:$0xff]  }
 0x7f0   : > { %v2731_v15 = vpop.f32.mrf.mxu1  ;;  %2744 = vmatpush3.bf16.msra.mxu1 %v3015_v1 }
 0x7f1   : > { %v4168_v16 = vadd.f32 %v2583_v13, %v1545_v14  ;;  %2755 = vmatprep.subr.bf16.mxu1 %v3599_v9 }
 0x7f2   : > { %v1542_v17 = vpop.f32.mrf.mxu1 }
 0x7f3   : > { %v1556_v18 = vsel %vm908_vm0, %v4168_v16, 0.0  ;;  %2746 = vmatmul.mubr.msk.bf16.vlgmr.msra.gmra.mxu1 %vm908_vm0, %v3016_v27 }
 0x7f4   : > { %1557 = vadd.xlane.f32.xlu1 %v1556_v18  ;;  %v2732_v19 = vpop.f32.mrf.mxu1  ;;  %2757 = vmatprep.mubr.msk.bf16.mxu1 %vm3600_vm1, %v3599_v9 }
 0x87d   : > { %v1558_v20 = vpop.xlane.xlu1 %1557 }
 0x87e   : > { %v1559_v21 = vmul.f32 0.03125, %v1558_v20 }
 0x880   : > { %v1560_v22 = vsub.f32 %v4168_v16, %v1559_v21 }
 0x882   : > { %v1561_v23 = vmul.f32 %v1560_v22, %v1560_v22 }
 0x884   : > { %v1562_v24 = vsel %vm908_vm0, %v1561_v23, 0.0 }
 0x885   : > { %1563 = vadd.xlane.f32.xlu0 %v1562_v24 }
 0x8b3   : > { %v1717_v40 = vpop.f32.mrf.mxu1 }
 0x8b4   : > { %v1718_v42 = vadd.f32 %v2590_v39, %v1717_v40 }
 0x8b5   : > { %v2747_v41 = vpop.f32.mrf.mxu1 }
 0x8b7   : > { %v1720_v43 = vpop.f32.mrf.mxu1 }
 0x8b8   : > { %v1721_v44 = vadd.f32 %v2590_v39, %v1720_v43 }
 0x8b9   : > { %v2748_v45 = vpop.f32.mrf.mxu1 }
 0x8ba   : > { %v4191_v46 = vpack.c.bf16 %v1721_v44, %v1718_v42 }
 0x8bc   : > { %1846 = vrot.lane.b32.xlu0 %v4191_v46, %s3601_s27  ;;  %v1739_v47 = vsel %vm1017_vm2, %v4191_v46, 0 }
 0x90e   : > { %v1564_v30 = vpop.xlane.xlu0 %1563 }
 0x90f   : > { %v1565_v31 = vmul.f32 0.03125, %v1564_v30 }
 0x911   : > { %v1566_v25 = vadd.f32 1e-05, %v1565_v31 }
 0x913   : > { %3039 = vrsqrt.f32 %v1566_v25 }
 0x920   : > { %v3040_v32 = vpop.eup %3039 }
 0x921   : > { %v1568_v34 = vmul.f32 %v3040_v32, %v1560_v22 }
 0x923   : > { %v1575_v36 = vmul.f32 %v2584_v33, %v1568_v34 }
 0x925   : > { %v1582_v37 = vadd.f32 %v2585_v35, %v1575_v36 }
 0x927   : > { %v1583_v38 = vpack.c.bf16 %v1582_v37, %v1582_v37 }
 0x929   : > { %2738 = vmatmul.mubr.msk.bf16.vlgmr.msra.gmra.mxu0 %vm908_vm0, %v1583_v38 }
 0x92a   : > { %2751 = vmatprep.mubr.msk.bf16.mxu0 %vm3600_vm1, %v3599_v9  ;;  %2750 = vmatpush3.bf16.xpose.msra.mxu0 %v1739_v47 }
 0x92b   : > { %2761 = vmatprep.subr.bf16.mxu0 %v3599_v9 }
 0x92e   : > { %v1847_v51 = vpop.permute.xlu0 %1846 }
 0x92f   : > { %v1852_v55 = vsel %vm1017_vm2, %v1847_v51, 0 }
 0x9e9   : > { %v1644_v49 = vpop.f32.mrf.mxu0 }
 0x9ea   : > { %v1645_v50 = vadd.f32 %v2586_v48, %v1644_v49 }
 0x9eb   : > { %v2739_v52 = vpop.f32.mrf.mxu0 }
 0x9ec   : > { %v1733_v53 = vpack.c.bf16 %v1645_v50, %v1645_v50 }
 0x9ed   : > { %v1647_v54 = vpop.f32.mrf.mxu0 }
 0x9ee   : > { %1960 = vrot.lane.b32.xlu0 %v1733_v53, %s3605_s29  ;;  %1844 = vrot.lane.b32.xlu1 %v1733_v53, %s3601_s27 }
 0x9ef   : > { %2752 = vmatmul.mubr.msk.bf16.vlgmr.msra.gmra.mxu0 %vm1017_vm2, %v1733_v53  ;;  %v2740_v56 = vpop.f32.mrf.mxu0 }
 0x9f0   : > { %2762 = vmatpush3.bf16.xpose.msra.mxu0 %v1852_v55  ;;  %2763 = vmatprep.mubr.msk.bf16.mxu0 %vm3600_vm1, %v3599_v9 }
 0x9f1   : > { %2773 = vmatprep.subr.bf16.mxu0 %v3599_v9 }
 0x9f2   : > { %2076 = vrot.lane.b32.xlu0 %v1733_v53, %s3607_s15  ;;  %1962 = vrot.lane.b32.xlu1 %v4191_v46, %s3605_s29 }
 0x9f6   : > { %2078 = vrot.lane.b32.xlu1 %v4191_v46, %s3607_s15  ;;  %s4412_s15 = sld [smem:[#allocation60_spill]] }
 0x9fc   : > { %s902_s14 = scalar_lea.vmem %s4412_s15, %s901_s6 }
 0x9fd   : > { %v2595_v2 = vld [vmem:[%s902_s14] ss:$0 sm:$0xff] }
 0x9fe   : > { %v1732_v3 = vadd.f32 %v2595_v2, %v1724_v0 }
 0xa60   : > { %v1845_v57 = vpop.permute.xlu1 %1844  ;;  %v1961_v61 = vpop.permute.xlu0 %1960 }
 0xa61   : > { %2764 = vmatmul.mubr.msk.bf16.vlgmr.msra.gmra.mxu0 %vm1017_vm2, %v1845_v57 }
 0xa62   : > { %2775 = vmatprep.mubr.msk.bf16.mxu0 %vm3600_vm1, %v3599_v9 }
 0xa64   : > { %v1963_v58 = vpop.permute.xlu1 %1962  ;;  %v2077_v63 = vpop.permute.xlu0 %2076 }
 0xa65   : > { %v1968_v59 = vsel %vm1017_vm2, %v1963_v58, 0 }
 0xa66   : > { %2774 = vmatpush3.bf16.xpose.msra.mxu0 %v1968_v59 }
 0xa67   : > { %2785 = vmatprep.subr.bf16.mxu0 %v3599_v9 }
 0xa68   : > { %v2079_v60 = vpop.permute.xlu1 %2078 }
 0xa69   : > { %v2084_v62 = vsel %vm1017_vm2, %v2079_v60, 0 }
 0xa6d   : > { %2776 = vmatmul.mubr.msk.bf16.vlgmr.msra.gmra.mxu0 %vm1017_vm2, %v1961_v61 }
 0xa6e   : > { %2786 = vmatpush3.bf16.xpose.msra.mxu0 %v2084_v62  ;;  %2787 = vmatprep.mubr.msk.bf16.mxu0 %vm3600_vm1, %v3599_v9 }
 0xa6f   : > { %2797 = vmatprep.subr.bf16.mxu0 %v3599_v9 }
 0xa75   : > { %2788 = vmatmul.mubr.msk.bf16.vlgmr.msra.gmra.mxu0 %vm1017_vm2, %v2077_v63 }
 0xa76   : > { %2801 = vmatprep.mubr.msk.bf16.mxu0 %vm3600_vm1, %v3599_v9 }
 0xaaf   : > { %v1775_v4 = vpop.f32.mrf.mxu0 }
 0xab0   : > { %v1776_v5 = vadd.f32 %v1775_v4, %v1732_v3 }
 0xab1   : > { %v2753_v6 = vpop.f32.mrf.mxu0 }
 0xab2   : > { %v1782_v7 = vsel %vm1781_vm8, %v1776_v5, -inf }
 0xab3   : > { %1783 = vmax.xlane.f32.xlu1 %v1782_v7  ;;  %v1778_v8 = vpop.f32.mrf.mxu0 }
 0xab5   : > { %v2754_v10 = vpop.f32.mrf.mxu0 }
 0xb21   : > { %v1888_v11 = vpop.f32.mrf.mxu0 }
 0xb22   : > { %v1889_v12 = vadd.f32 %v1888_v11, %v1732_v3 }
 0xb23   : > { %v2765_v13 = vpop.f32.mrf.mxu0 }
 0xb24   : > { %v1894_v14 = vsel %vm1781_vm8, %v1889_v12, -inf }
 0xb25   : > { %1895 = vmax.xlane.f32.xlu0 %v1894_v14  ;;  %v1891_v15 = vpop.f32.mrf.mxu0 }
 0xb27   : > { %v2766_v17 = vpop.f32.mrf.mxu0 }
 0xb2d   : > { %v2004_v18 = vpop.f32.mrf.mxu0 }
 0xb2e   : > { %v2005_v19 = vadd.f32 %v2004_v18, %v1732_v3 }
 0xb2f   : > { %v2777_v20 = vpop.f32.mrf.mxu0 }
 0xb30   : > { %v2010_v21 = vsel %vm1781_vm8, %v2005_v19, -inf  ;;  %v3019_v20 = vld [vmem:[#allocation24 + $0x8] sm:$0xff]  }
 0xb31   : > { %2011 = vmax.xlane.f32.xlu0 %v2010_v21  ;;  %v2007_v22 = vpop.f32.mrf.mxu0  ;;  %2798 = vmatpush3.bf16.msra.mxu0 %v3019_v20 }
 0xb32   : > { %v3020_v22 = vld [vmem:[#allocation24] sm:$0xff]   ;;  %2799 = vmatprep.subr.bf16.mxu0 %v3599_v9 }
 0xb33   : > { %v2778_v23 = vpop.f32.mrf.mxu0 }
 0xb35   : > { %v2120_v24 = vpop.f32.mrf.mxu0  ;;  %2800 = vmatpush3.bf16.msra.mxu0 %v3020_v22 }
 0xb36   : > { %v2121_v26 = vadd.f32 %v2120_v24, %v1732_v3 }
 0xb37   : > { %v2789_v1 = vpop.f32.mrf.mxu0 }
 0xb38   : > { %v2126_v27 = vsel %vm1781_vm8, %v2121_v26, -inf }
 0xb39   : > { %2127 = vmax.xlane.f32.xlu1 %v2126_v27  ;;  %v2123_v28 = vpop.f32.mrf.mxu0 }
 0xb3b   : > { %v2790_v29 = vpop.f32.mrf.mxu0 }
 0xb3c   : > { %v1784_v30 = vpop.xlane.xlu1 %1783 }
 0xb3d   : > { %v1785_v31 = vsub.f32 %v1776_v5, %v1784_v30 }
 0xb3f   : > { %v1786_v25 = vmul.f32 1.442695, %v1785_v31 }
 0xb41   : > { %3041 = vpow2.f32 %v1786_v25 }
 0xb4e   : > { %v3042_v32 = vpop.eup %3041 }
 0xb4f   : > { %v1788_v33 = vsel %vm1781_vm8, %v3042_v32, 0.0 }
 0xb50   : > { %1789 = vadd.xlane.f32.xlu0 %v1788_v33  ;;  %v2610_v33 = vld [vmem:[#allocation26] ss:$0 sm:$0xff] }
 0xbae   : > { %v1896_v34 = vpop.xlane.xlu0 %1895 }
 0xbaf   : > { %v1897_v35 = vsub.f32 %v1889_v12, %v1896_v34 }
 0xbb1   : > { %v1898_v36 = vmul.f32 1.442695, %v1897_v35 }
 0xbb3   : > { %3043 = vpow2.f32 %v1898_v36 }
 0xbba   : > { %v2012_v37 = vpop.xlane.xlu0 %2011 }
 0xbbb   : > { %v2013_v38 = vsub.f32 %v2005_v19, %v2012_v37 }
 0xbbd   : > { %v2014_v39 = vmul.f32 1.442695, %v2013_v38 }
 0xbbf   : > { %3045 = vpow2.f32 %v2014_v39 }
 0xbc0   : > { %v3044_v40 = vpop.eup %3043 }
 0xbc1   : > { %v1900_v41 = vsel %vm1781_vm8, %v3044_v40, 0.0 }
 0xbc2   : > { %1901 = vadd.xlane.f32.xlu1 %v1900_v41  ;;  %v2128_v44 = vpop.xlane.xlu1 %2127 }
 0xbc3   : > { %v2129_v45 = vsub.f32 %v2121_v26, %v2128_v44 }
 0xbc5   : > { %v2130_v47 = vmul.f32 1.442695, %v2129_v45 }
 0xbc7   : > { %3047 = vpow2.f32 %v2130_v47 }
 0xbcc   : > { %v3046_v42 = vpop.eup %3045 }
 0xbcd   : > { %v2016_v43 = vsel %vm1781_vm8, %v3046_v42, 0.0 }
 0xbce   : > { %2017 = vadd.xlane.f32.xlu0 %v2016_v43 }
 0xbd3   : > { %1906 = vrot.lane.b32.xlu1 %v4191_v46, %s3603_s21  ;;  %s899_s21 = scalar_lea.vmem [#allocation29], %s2546_s30 }
 0xbd4   : > { %v3048_v48 = vpop.eup %3047 }
 0xbd5   : > { %v2132_v49 = vsel %vm1781_vm8, %v3048_v48, 0.0 }
 0xbd9   : > { %v1790_v50 = vpop.xlane.xlu0 %1789 }
 0xbda   : > { %3049 = vrcp.f32 %v1790_v50 }
 0xbe4   : > { %1795 = vrot.lane.b32.xlu0 %v4191_v46, %s3602_s12  ;;  %s2612_s12 = sshll.u32 %s3742_s3, 6  ;;  %s3615_s3 = smov [#allocation29]  }
 0xbe5   : > { %s3483_s30 = sshll.u32 %s3615_s3, 4  ;;  %s3484_s30 = int_to_ptr.vmem [resolvable:$false] %s3483_s30 }
 0xbe6   : > { %s3485_s9 = scalar_lea.vmem %s3484_s30, 128 }
 0xbe7   : > { %v3050_v52 = vpop.eup %3049 }
 0xbe8   : > { %2138 = vrot.lane.b32.xlu0 %v4191_v46, %s3606_s8  ;;  %v1792_v54 = vmul.f32 %v3050_v52, %v3042_v32 }
 0xbea   : > { %v1793_v56 = vpack.c.bf16 %v1792_v54, %v1792_v54 }
 0xbf7   : > { %2133 = vadd.xlane.f32.xlu1 %v2132_v49 }
 0xc08   : > { %2022 = vrot.lane.b32.xlu1 %v4191_v46, %s3604_s11  ;;  %s2278_s11 = sshll.u32 %s899_s21, 4  ;;  %s2279_s11 = int_to_ptr.vmem [resolvable:$true] %s2278_s11 }
 0xc09   : > { %s3479_s13 = scalar_lea.vmem %s2279_s11, 64  ;;  %p3486_p11 = scmp.lt.s32.totalorder %s2279_s11, %s3484_s30 }
 0xc0a   : > { %p3480_p1 = scmp.ne.s32.totalorder %s2279_s11, %s3479_s13  ;;  %p3487_p7 = scmp.lt.s32.totalorder %s3485_s9, %s3479_s13 }
 0xc0c   : > { %p3481_p9 = pnand %p3480_p1, %p4415_p8  ;;  %p3488_p5 = por %p3487_p7, %p3486_p11 }
 0xc0e   : > { %p3482_p12 = pneg %p3481_p9 }
 0xc10   : > { %p3489_p3 = pnand %p3488_p5, %p3482_p12 }
 0xc4b   : > { %v1902_v51 = vpop.xlane.xlu1 %1901 }
 0xc4c   : > { %3051 = vrcp.f32 %v1902_v51 }
 0xc4f   : > { %v1907_v58 = vpop.permute.xlu1 %1906 }
 0xc57   : > { %v2018_v53 = vpop.xlane.xlu0 %2017 }
 0xc58   : > { %3053 = vrcp.f32 %v2018_v53 }
 0xc59   : > { %v3052_v57 = vpop.eup %3051 }
 0xc5a   : > { %v1904_v46 = vmul.f32 %v3052_v57, %v3044_v40 }
 0xc5b   : > { %v1796_v55 = vpop.permute.xlu0 %1795 }
 0xc5c   : > { %2756 = vmatpush3.bf16.msra.mxu1 %v1796_v55  ;;  %v1905_v59 = vpack.c.bf16 %v1904_v46, %v1904_v46 }
 0xc5d   : > { %2767 = vmatprep.subr.bf16.mxu1 %v3599_v9 }
 0xc5f   : > { %2758 = vmatmul.mubr.msk.bf16.vlgmr.msra.gmra.mxu1 %vm1781_vm8, %v1793_v56  ;;  %v2139_v2 = vpop.permute.xlu0 %2138 }
 0xc60   : > { %2768 = vmatpush3.bf16.msra.mxu1 %v1907_v58  ;;  %2769 = vmatprep.mubr.msk.bf16.mxu1 %vm3600_vm1, %v3599_v9 }
 0xc61   : > { %2779 = vmatprep.subr.bf16.mxu1 %v3599_v9 }
 0xc65   : > { %v3054_v60 = vpop.eup %3053 }
 0xc66   : > { %v2020_v62 = vmul.f32 %v3054_v60, %v3046_v42 }
 0xc67   : > { %2770 = vmatmul.mubr.msk.bf16.vlgmr.msra.gmra.mxu1 %vm1781_vm8, %v1905_v59 }
 0xc68   : > { %2781 = vmatprep.mubr.msk.bf16.mxu1 %vm3600_vm1, %v3599_v9  ;;  %v2021_v0 = vpack.c.bf16 %v2020_v62, %v2020_v62 }
 0xc80   : > { %v2134_v61 = vpop.xlane.xlu1 %2133 }
 0xc81   : > { %3055 = vrcp.f32 %v2134_v61 }
 0xc84   : > { %v2023_v63 = vpop.permute.xlu1 %2022 }
 0xc85   : > { %2780 = vmatpush3.bf16.msra.mxu1 %v2023_v63 }
 0xc86   : > { %2791 = vmatprep.subr.bf16.mxu1 %v3599_v9 }
 0xc88   : > { %2782 = vmatmul.mubr.msk.bf16.vlgmr.msra.gmra.mxu1 %vm1781_vm8, %v2021_v0 }
 0xc89   : > { %2792 = vmatpush3.bf16.msra.mxu1 %v2139_v2  ;;  %2793 = vmatprep.mubr.msk.bf16.mxu1 %vm3600_vm1, %v3599_v9 }
 0xc8e   : > { %v3056_v3 = vpop.eup %3055 }
 0xc8f   : > { %v2136_v4 = vmul.f32 %v3056_v3, %v3048_v48 }
 0xc91   : > { %v2137_v5 = vpack.c.bf16 %v2136_v4, %v2136_v4 }
 0xc93   : > { %2794 = vmatmul.mubr.msk.bf16.vlgmr.msra.gmra.mxu1 %vm1781_vm8, %v2137_v5 }
 0xd1f   : > { %v1835_v6 = vpop.f32.mrf.mxu1 }
 0xd20   : > { %v1841_v7 = vpack.c.bf16 %v1835_v6, %v1835_v6 }
 0xd21   : > { %v2759_v8 = vpop.f32.mrf.mxu1 }
 0xd22   : > { %1842 = vst.msk [vmem:[#allocation2] sm:$0xf] %vm1126_vm4, %v1841_v7 }
 0xd23   : > { %v1838_v10 = vpop.f32.mrf.mxu1 }
 0xd25   : > { %v2760_v11 = vpop.f32.mrf.mxu1 }
 0xd27   : > { %v1946_v12 = vpop.f32.mrf.mxu1 }
 0xd28   : > { %v2619_v13 = vpack.c.bf16 %v1946_v12, %v1946_v12 }
 0xd29   : > { %v2771_v14 = vpop.f32.mrf.mxu1 }
 0xd2a   : > { %1956 = vrot.lane.b32.xlu1 %v2619_v13, %s3612_s20  ;;  %s4414_s20 = sld [smem:[#allocation61_spill]] }
 0xd2b   : > { %v1949_v15 = vpop.f32.mrf.mxu1 }
 0xd2d   : > { %v2772_v17 = vpop.f32.mrf.mxu1 }
 0xd48   : > { %v2062_v18 = vpop.f32.mrf.mxu1 }
 0xd49   : > { %v2620_v19 = vpack.c.bf16 %v2062_v18, %v2062_v18 }
 0xd4a   : > { %v2783_v21 = vpop.f32.mrf.mxu1 }
 0xd4b   : > { %2072 = vrot.lane.b32.xlu0 %v2620_v19, %s3613_s7  ;;  %s4276_s7 = scalar_lea.hbm %s4414_s20, %s2612_s12 }
 0xd4c   : > { %v2065_v23 = vpop.f32.mrf.mxu1 }
 0xd4e   : > { %v2784_v24 = vpop.f32.mrf.mxu1 }
 0xd53   : > { %v2178_v26 = vpop.f32.mrf.mxu1 }
 0xd54   : > { %v2621_v1 = vpack.c.bf16 %v2178_v26, %v2178_v26 }
 0xd55   : > { %v2795_v27 = vpop.f32.mrf.mxu1 }
 0xd56   : > { %2188 = vrot.lane.b32.xlu1 %v2621_v1, %s3614_s26  ;;  %s2265_s26 = scalar_lea.sflag [#allocation5], %s4012_s23 }
 0xd57   : > { %v2181_v28 = vpop.f32.mrf.mxu1 }
 0xd59   : > { %v2796_v29 = vpop.f32.mrf.mxu1 }
 0xd9c   : > { %v1957_v30 = vpop.permute.xlu1 %1956 }
 0xd9d   : > { %1959 = vst.msk [vmem:[#allocation2] sm:$0xf] %vm1245_vm5, %v1957_v30 }
 0xdbd   : > { %v2073_v31 = vpop.permute.xlu0 %2072 }
 0xdbe   : > { %2075 = vst.msk [vmem:[#allocation2] sm:$0xf] %vm1364_vm6, %v2073_v31 }
 0xdc8   : > { %v2189_v25 = vpop.permute.xlu1 %2188 }
 0xdc9   : > { %2191 = vst.msk [vmem:[#allocation2] sm:$0xf] %vm1483_vm7, %v2189_v25 }
 0xdd0   : > { %v2192_v9 = vld [vmem:[#allocation2] sm:$0xf] }
 0xdd1   : > { %2802 = vmatmul.mubr.msk.bf16.vlgmr.msra.gmra.mxu0 %vm908_vm0, %v2192_v9 }
 0xe91   : > { %v2246_v32 = vpop.f32.mrf.mxu0 }
 0xe92   : > { %v2252_v34 = vadd.f32 %v2246_v32, %v4168_v16 }
 0xe93   : > { %v2803_v35 = vpop.f32.mrf.mxu0 }
 0xe94   : > { %v2260_v36 = vadd.f32 %v2610_v33, %v2252_v34 }
 0xe95   : > { %v2249_v37 = vpop.f32.mrf.mxu0 }
 0xe96   : > { %v2261_v38 = vpack.c.bf16 %v2260_v36, %v2260_v36 }
 0xe97   : > { %v2804_v39 = vpop.f32.mrf.mxu0 }
 0xe98   : > { %2263 = vst.msk [vmem:[%s899_s21] sm:$0xf] %vm2262_vm9, %v2261_v38 }
 0xe99   : > { %3492 = shalt.err (!%p3489_p3)
}
 0xe9a   : > { %s3493_s25 = scalar_lea.hbm %s4276_s7, 64  ;;  %s3497_s6 = scalar_lea.hbm %s4414_s20, 128 }
 0xe9b   : > { %p3494_p10 = scmp.ne.s32.totalorder %s4276_s7, %s3493_s25  ;;  %p3498_p4 = scmp.lt.s32.totalorder %s4276_s7, %s4414_s20 }
 0xe9c   : > { %p3499_p2 = scmp.lt.s32.totalorder %s3497_s6, %s3493_s25 }
 0xe9d   : > { %p3495_p6 = pnand %p3494_p10, %p4415_p8 }
 0xe9e   : > { %p3500_p13 = por %p3499_p2, %p3498_p4 }
 0xe9f   : > { %p3496_p0 = pneg %p3495_p6 }
 0xea1   : > { %p3501_p1 = pnand %p3500_p13, %p3496_p0 }
 0xea3   : > { %3504 = shalt.err (!%p3501_p1)
}
 0xea4   : > { %2863 = dma.vmem_to_hbm [thread:$0]  (%p4415_p8), %s2279_s11, 64, %s4276_s7, %s2265_s26  }
 0xea5 PF: > { %s2290_s15 = sand.u32 1, %s3567_s1   ;;  %p4416_p9 = scmp.ne.s32.totalorder %s4388_s18, 0 }
 0xea6   : > { %p4417_p12 = scmp.ge.s32.totalorder %s3579_s24, 2  ;;  %s2291_s14 = scalar_lea.sflag [#allocation5], %s2290_s15 }
 0xea8   : > { %p2916_p11 = pnand %p4417_p12, %p4416_p9 }
 0xeaa   : > { %p2917_p7 = pneg %p2916_p11 }
 0xeac   : > { %3562 = dma.done.wait (%p2917_p7), %s2291_s14, 64  }
 0xead   : > { %3564 = vsyncadd (%p2917_p7), %s2291_s14, 4294967232  ;;  %s4418_s24 = sld [smem:[#allocation42_spill]]  ;;  %s4421_s1 = smov %s3571_s22 }
 0xeae   : > { %s4419_s28 = sld [smem:[#allocation41_spill]] }
 0xeaf   : > { %s4420_s23 = sld [smem:[#allocation43_spill]] }
 0xeb3   : > { %p45_p5 = scmp.ge.s32.totalorder %s4418_s24, 4  }
 0xeb4   : > { %s4422_s22 = smov %s4419_s28 }
 0xeb5   :  { %47 = sbr.rel (!%p45_p5) target bundleno = 34 (0x22), region = 226 }
 0xeba   :  { %2296 = vsyncpa [#allocation4], 1 }
 0xebb   :  { %2298 = vsyncpa [#allocation4 + $0x1], 1 }
 0xebc   :  { %2299 = vsyncpa [#allocation7], 1 }
 0xebd   :  { %2301 = vsyncpa [#allocation7 + $0x1], 1 }
 0xebe   :  { %2302 = vsyncpa [#allocation10], 1 }
 0xebf   :  { %2303 = vsyncpa [#allocation13], 1 }
 0xec0   :  { %2304 = vsyncpa [#allocation16], 1 }
 0xec1   :  { %2305 = vsyncpa [#allocation19], 1 }
 0xec2   :  { %2306 = vsyncpa [#allocation22], 1 }
 0xec3   :  { %2307 = vsyncpa [#allocation25], 1 }
 0xec4   :  { %2308 = vsyncpa [#allocation28], 1 }
 0xec5   :  { %2310 = vsyncpa [#allocation28 + $0x1], 1 }
 0xec6   :  { %2311 = vsyncpa [#allocation5], 1 }
 0xec7   :  { %2313 = vsyncpa [#allocation5 + $0x1], 1 }

</bundles_post_ra>
